<compile_context>
chip_gen: v6e
topology: v6e:2x2x1
jax: 0.10.0
libtpu: 0.0.40
codegen_flags: <defaults>
</compile_context>

<pallas_src>
import functools
import math

import jax
import jax.numpy as jnp
from jax import lax
from jax.experimental import pallas as pl
from jax.experimental.pallas import tpu as pltpu


def _round_up(v, m):
    return (v + m - 1) // m * m


def _pick_row_tile(n, want):
    """Row tile size and padded row count.

    Prefers a reasonably large divisor of n (no padding); otherwise pads n to a
    sublane-aligned multiple of a bounded tile so awkward batch sizes never
    force a huge (or tiny) tile.
    """
    for cand in (want, 1024, 512, 256, 128):
        if 0 < cand <= n and n % cand == 0 and (cand % 8 == 0 or cand == n):
            return cand, n
    if n <= max(want, 256):
        tm = max(_round_up(n, 8), 8)          # one padded, sublane-aligned tile
        return tm, tm
    tm = max(_round_up(min(want, 512), 8), 8)
    return tm, _round_up(n, tm)


def _vmem_budget():
    """Physical VMEM capacity with headroom for Mosaic internal scratch."""
    try:
        cap = int(pltpu.get_tpu_info().vmem_capacity_bytes)
    except Exception:
        cap = 64 << 20                        # conservative (v7x-sized) default
    return (cap * 3) // 4


# --------------------------------------------------------------------------
# Fused path: fc1 + relu + fc2 + relu + BatchNorm1d in a single kernel.
# --------------------------------------------------------------------------
def _mlp_fused_kernel(x_ref, w1_ref, b1_ref, w2_ref, b2_ref, gamma_ref, beta_ref,
                      o_ref, sum_ref, sumsq_ref,
                      *, tm, n_true, n_tiles, eps, apply_bn, need_mask):
    i = pl.program_id(0)

    x = x_ref[...]                                                # (tm, d_in)
    h = jnp.dot(x, w1_ref[...], preferred_element_type=jnp.float32) + b1_ref[...]
    h = jnp.maximum(h, 0.0)
    # TODO(synk): dropout (module default p=0.0 / eval mode) is identity here;
    # a training-mode p>0 path would use pltpu.prng_seed + stateful_bernoulli.
    y = jnp.dot(h, w2_ref[...], preferred_element_type=jnp.float32) + b2_ref[...]
    y = jnp.maximum(y, 0.0)

    # The whole (n_pad, d_out) output is VMEM-resident (constant index_map);
    # stash this tile's rows into it.
    start = pl.multiple_of(i * tm, tm)
    o_ref[pl.ds(start, tm), :] = y

    if apply_bn:
        @pl.when(i == 0)
        def _():
            sum_ref[...] = jnp.zeros_like(sum_ref)
            sumsq_ref[...] = jnp.zeros_like(sumsq_ref)

        if need_mask:
            row = i * tm + lax.broadcasted_iota(jnp.int32, (tm, 1), 0)
            ym = jnp.where(row < n_true, y, 0.0)
        else:
            ym = y
        sum_ref[...] += jnp.sum(ym, axis=0, keepdims=True)        # (1, d_out)
        sumsq_ref[...] += jnp.sum(ym * ym, axis=0, keepdims=True)

        @pl.when(i == n_tiles - 1)
        def _():
            count = jnp.float32(n_true)
            mean = sum_ref[...] / count
            var = sumsq_ref[...] / count - mean * mean            # biased var
            inv_std = lax.rsqrt(var + eps)
            scale = gamma_ref[...] * inv_std
            shift = beta_ref[...] - mean * scale
            o_ref[...] = o_ref[...] * scale + shift               # in-place in VMEM


# --------------------------------------------------------------------------
# Large-n fallback: matmul kernel (packed BN partials) + BN-apply kernel.
# --------------------------------------------------------------------------
def _mlp_matmul_kernel(x_ref, w1_ref, b1_ref, w2_ref, b2_ref,
                       y_ref, stats_ref, *, tm, n_true, need_mask):
    x = x_ref[...]
    h = jnp.maximum(
        jnp.dot(x, w1_ref[...], preferred_element_type=jnp.float32) + b1_ref[...], 0.0)
    # TODO(synk): dropout p>0 (training) not implemented; identity here.
    y = jnp.maximum(
        jnp.dot(h, w2_ref[...], preferred_element_type=jnp.float32) + b2_ref[...], 0.0)
    y_ref[...] = y.astype(y_ref.dtype)

    if need_mask:
        i = pl.program_id(0)
        row = i * tm + lax.broadcasted_iota(jnp.int32, (tm, 1), 0)
        ym = jnp.where(row < n_true, y, 0.0)
    else:
        ym = y
    s = jnp.sum(ym, axis=0, keepdims=True)                        # (1, d_out)
    sq = jnp.sum(ym * ym, axis=0, keepdims=True)                  # (1, d_out)
    stats_ref[...] = jnp.concatenate([s, sq], axis=0).reshape(1, 2, -1)


def _bn_apply_kernel(stats_ref, gamma_ref, beta_ref, y_ref, o_ref, *, n_true, eps):
    # Cross-tile reduce + rsqrt + scale/shift prep done in-kernel (hidden under
    # the y-tile DMA) instead of as tiny XLA ops between the two pallas_calls.
    st = stats_ref[...]                                           # (n_tiles, 2, d_out)
    tot = jnp.sum(st, axis=0)                                     # (2, d_out)
    count = jnp.float32(n_true)
    mean = tot[0:1, :] / count
    ex2 = tot[1:2, :] / count
    inv_std = lax.rsqrt(ex2 - mean * mean + eps)
    scale = gamma_ref[...] * inv_std
    shift = beta_ref[...] - mean * scale
    o_ref[...] = (y_ref[...] * scale + shift).astype(o_ref.dtype)


# --------------------------------------------------------------------------
# Wrapper
# --------------------------------------------------------------------------
def mlp_forward(x, w1, b1, w2, b2, gamma, beta, *, eps=1e-5, tile_rows=256,
                force_two_pass=False):
    """MLP.forward semantics.

    x: (..., D_in)
    w1: (D_in, H)   = fc1.weight.T   (pre-transposed: in x out)
    b1: (H,), w2: (H, D_out) = fc2.weight.T, b2: (D_out,)
    gamma, beta: (D_out,) BatchNorm1d affine params.
    BatchNorm uses training-mode batch statistics over all collapsed rows,
    biased variance, eps=1e-5 (running-stat updates / eval mode not modeled).
    """
    orig_lead = x.shape[:-1]
    d_in = x.shape[-1]
    h_dim = w1.shape[1]
    d_out = w2.shape[1]
    n = math.prod(orig_lead) if orig_lead else 1

    if n == 0:
        return jnp.zeros((*orig_lead, d_out), x.dtype)

    x2 = x.reshape(n, d_in).astype(jnp.float32)
    tm, n_pad = _pick_row_tile(n, tile_rows)
    n_tiles = n_pad // tm
    if n_pad != n:
        x2 = jnp.pad(x2, ((0, n_pad - n), (0, 0)))

    apply_bn = n > 1        # MLP.batch_norm skips when numel == output_dim or 0
    pad_mask = n_pad != n

    w1f = w1.astype(jnp.float32)
    w2f = w2.astype(jnp.float32)
    b1r = b1.reshape(1, h_dim).astype(jnp.float32)
    b2r = b2.reshape(1, d_out).astype(jnp.float32)
    g = gamma.reshape(1, d_out).astype(jnp.float32)
    bt = beta.reshape(1, d_out).astype(jnp.float32)

    f32b = 4
    vmem_ceiling = _vmem_budget()
    weights_bytes = f32b * 2 * (d_in * h_dim + h_dim * d_out)     # double-buffered
    small_bytes = f32b * 2 * (h_dim + 3 * d_out)

    cost = pl.CostEstimate(
        flops=2 * n_pad * (d_in * h_dim + h_dim * d_out),
        transcendentals=0,
        bytes_accessed=f32b * (n_pad * d_in + n_pad * d_out
                               + d_in * h_dim + h_dim * d_out
                               + h_dim + 3 * d_out),
    )

    # Fused single-kernel path: whole (n_pad, d_out) activation + BN stats live
    # in VMEM, eliminating the y HBM round trip and the second launch.
    fused_bytes = (f32b * (2 * tm * d_in + tm * h_dim + 2 * n_pad * d_out + 4 * d_out)
                   + weights_bytes + small_bytes)
    use_fused = (not force_two_pass) and (fused_bytes + (4 << 20) <= vmem_ceiling)

    if use_fused:
        kernel = functools.partial(
            _mlp_fused_kernel, tm=tm, n_true=n, n_tiles=n_tiles, eps=eps,
            apply_bn=apply_bn, need_mask=(apply_bn and pad_mask))
        vmem_limit = int(min(max(fused_bytes + (4 << 20), 16 << 20), vmem_ceiling))
        out = pl.pallas_call(
            kernel,
            out_shape=jax.ShapeDtypeStruct((n_pad, d_out), jnp.float32),
            grid_spec=pltpu.PrefetchScalarGridSpec(
                num_scalar_prefetch=0,
                grid=(n_tiles,),
                in_specs=[
                    pl.BlockSpec((tm, d_in), lambda i: (i, 0)),       # x rows
                    pl.BlockSpec((d_in, h_dim), lambda i: (0, 0)),    # W1 (resident)
                    pl.BlockSpec((1, h_dim), lambda i: (0, 0)),       # b1
                    pl.BlockSpec((h_dim, d_out), lambda i: (0, 0)),   # W2 (resident)
                    pl.BlockSpec((1, d_out), lambda i: (0, 0)),       # b2
                    pl.BlockSpec((1, d_out), lambda i: (0, 0)),       # gamma
                    pl.BlockSpec((1, d_out), lambda i: (0, 0)),       # beta
                ],
                out_specs=pl.BlockSpec((n_pad, d_out), lambda i: (0, 0)),  # resident
                scratch_shapes=[pltpu.VMEM((1, d_out), jnp.float32),
                                pltpu.VMEM((1, d_out), jnp.float32)],
            ),
            compiler_params=pltpu.CompilerParams(
                dimension_semantics=("arbitrary",),   # accumulator + resident output
                vmem_limit_bytes=vmem_limit,
            ),
            cost_estimate=cost,
        )(x2, w1f, b1r, w2f, b2r, g, bt)

        out = out[:n] if pad_mask else out
        return out.astype(x.dtype).reshape(*orig_lead, d_out)

    # ---------------- large-n fallback: two lane-dense kernels ----------------
    two_pass_bytes = (f32b * (2 * tm * d_in + tm * h_dim + 2 * tm * d_out
                              + 4 * 2 * d_out)
                      + weights_bytes + small_bytes)
    vmem_limit1 = int(min(max(two_pass_bytes + (4 << 20), 16 << 20), vmem_ceiling))

    mm_kernel = functools.partial(_mlp_matmul_kernel, tm=tm, n_true=n,
                                  need_mask=pad_mask)
    y, stats = pl.pallas_call(
        mm_kernel,
        out_shape=(jax.ShapeDtypeStruct((n_pad, d_out), jnp.float32),
                   jax.ShapeDtypeStruct((n_tiles, 2, d_out), jnp.float32)),
        grid_spec=pltpu.PrefetchScalarGridSpec(
            num_scalar_prefetch=0,
            grid=(n_tiles,),
            in_specs=[
                pl.BlockSpec((tm, d_in), lambda i: (i, 0)),
                pl.BlockSpec((d_in, h_dim), lambda i: (0, 0)),
                pl.BlockSpec((1, h_dim), lambda i: (0, 0)),
                pl.BlockSpec((h_dim, d_out), lambda i: (0, 0)),
                pl.BlockSpec((1, d_out), lambda i: (0, 0)),
            ],
            out_specs=(pl.BlockSpec((tm, d_out), lambda i: (i, 0)),
                       pl.BlockSpec((1, 2, d_out), lambda i: (i, 0, 0))),
        ),
        compiler_params=pltpu.CompilerParams(
            dimension_semantics=("parallel",),
            vmem_limit_bytes=vmem_limit1,
        ),
        cost_estimate=cost,
    )(x2, w1f, b1r, w2f, b2r)

    if not apply_bn:
        y = y[:n] if pad_mask else y
        return y.astype(x.dtype).reshape(*orig_lead, d_out)

    # BN apply: larger streaming row tile, in-kernel stats reduce, in-place y.
    tm2 = n_pad
    if n_pad > 4096:
        for cand in (4096, 2048, 1024, 512, 256, 128, tm):
            if n_pad % cand == 0:
                tm2 = cand
                break
    n_tiles2 = n_pad // tm2
    bn_bytes = f32b * (4 * tm2 * d_out + 2 * (n_tiles * 2 * d_out + 2 * d_out))
    vmem_limit2 = int(min(max(bn_bytes + (4 << 20), 16 << 20), vmem_ceiling))

    bn_kernel = functools.partial(_bn_apply_kernel, n_true=n, eps=eps)
    out = pl.pallas_call(
        bn_kernel,
        out_shape=jax.ShapeDtypeStruct((n_pad, d_out), jnp.float32),
        grid_spec=pltpu.PrefetchScalarGridSpec(
            num_scalar_prefetch=0,
            grid=(n_tiles2,),
            in_specs=[
                pl.BlockSpec((n_tiles, 2, d_out), lambda i: (0, 0, 0)),  # stats resident
                pl.BlockSpec((1, d_out), lambda i: (0, 0)),              # gamma
                pl.BlockSpec((1, d_out), lambda i: (0, 0)),              # beta
                pl.BlockSpec((tm2, d_out), lambda i: (i, 0)),            # y rows
            ],
            out_specs=pl.BlockSpec((tm2, d_out), lambda i: (i, 0)),
        ),
        compiler_params=pltpu.CompilerParams(
            dimension_semantics=("parallel",),
            vmem_limit_bytes=vmem_limit2,
        ),
        input_output_aliases={3: 0},   # normalize y in place (no extra HBM alloc)
    )(stats, g, bt, y)

    out = out[:n] if pad_mask else out
    return out.astype(x.dtype).reshape(*orig_lead, d_out)


# --------------------------------------------------------------------------
# Demo / self-check
# --------------------------------------------------------------------------
def _reference(x, w1, b1, w2, b2, gamma, beta, eps=1e-5):
    hp = lax.Precision.HIGHEST
    h = jax.nn.relu(jnp.dot(x, w1, precision=hp) + b1)
    y = jax.nn.relu(jnp.dot(h, w2, precision=hp) + b2)
    d_out = w2.shape[1]
    y2 = y.reshape(-1, d_out)
    if y2.shape[0] <= 1:
        return y
    mean = y2.mean(axis=0)
    var = ((y2 - mean) ** 2).mean(axis=0)        # biased variance (PyTorch BN)
    out = (y2 - mean) / jnp.sqrt(var + eps) * gamma + beta
    return out.reshape(y.shape)


if __name__ == "__main__":
    # GKT applies this MLP to (batch, concept_num, feature) activations.
    input_dim, hidden_dim, output_dim = 128, 128, 128

    key = jax.random.PRNGKey(0)
    kx, kw1, kw2, kx2 = jax.random.split(key, 4)

    def xavier_normal(k, fan_in, fan_out):
        std = math.sqrt(2.0 / (fan_in + fan_out))
        return std * jax.random.normal(k, (fan_in, fan_out), jnp.float32)

    # Parameters matching MLP.init_weights(): xavier_normal_ linear weights,
    # linear bias = 0.1, BatchNorm1d weight = 1, bias = 0.  Linear weights are
    # stored pre-transposed [in_features, out_features] for plain x @ W.
    w1 = xavier_normal(kw1, input_dim, hidden_dim)      # fc1.weight.T
    b1 = jnp.full((hidden_dim,), 0.1, jnp.float32)
    w2 = xavier_normal(kw2, hidden_dim, output_dim)     # fc2.weight.T
    b2 = jnp.full((output_dim,), 0.1, jnp.float32)
    gamma = jnp.ones((output_dim,), jnp.float32)
    beta = jnp.zeros((output_dim,), jnp.float32)

    def check(x, **kw):
        out = jax.block_until_ready(mlp_forward(x, w1, b1, w2, b2, gamma, beta, **kw))
        ref = _reference(x, w1, b1, w2, b2, gamma, beta)
        assert out.shape == ref.shape, f"shape mismatch {out.shape} vs {ref.shape}"
        assert jnp.allclose(out, ref, atol=5e-4, rtol=5e-4), "mismatch vs reference"

    # Main case: batch*concepts = 512 rows, lane/sublane friendly (fused path).
    x_main = jax.random.normal(kx, (4, 128, input_dim), jnp.float32)
    check(x_main)
    # Same input through the large-n two-kernel fallback path.
    check(x_main, force_two_pass=True)
    # Awkward row count (3*7 = 21 rows) exercising padding + stats masking.
    x_odd = jax.random.normal(kx2, (3, 7, input_dim), jnp.float32)
    check(x_odd)
    check(x_odd, force_two_pass=True)

    print("KERNEL_OK")
</pallas_src>

<mosaic_0001>
module attributes {stable_mosaic.version = 11 : i64} {
  func.func @_mlp_fused_kernel(%arg0: i32, %arg1: memref<256x128xf32, #tpu.memory_space<vmem>>, %arg2: memref<128x128xf32, #tpu.memory_space<vmem>>, %arg3: memref<1x128xf32, #tpu.memory_space<vmem>>, %arg4: memref<128x128xf32, #tpu.memory_space<vmem>>, %arg5: memref<1x128xf32, #tpu.memory_space<vmem>>, %arg6: memref<1x128xf32, #tpu.memory_space<vmem>>, %arg7: memref<1x128xf32, #tpu.memory_space<vmem>>, %arg8: memref<512x128xf32, #tpu.memory_space<vmem>>, %arg9: memref<1x128xf32, #tpu.memory_space<vmem>>, %arg10: memref<1x128xf32, #tpu.memory_space<vmem>>) attributes {dimension_semantics = [#tpu.dimension_semantics<arbitrary>], iteration_bounds = array<i64: 2>, scalar_prefetch = 0 : i64, scratch_operands = 2 : i64, tpu.core_type = #tpu.core_type<tc>, window_params = [{transform_indices = @transform_0, window_bounds = array<i64: 256, 128>}, {pipeline_mode = #tpu.pipeline_mode<synchronous>, transform_indices = @transform_1, window_bounds = array<i64: 128, 128>}, {pipeline_mode = #tpu.pipeline_mode<synchronous>, transform_indices = @transform_2, window_bounds = array<i64: 1, 128>}, {pipeline_mode = #tpu.pipeline_mode<synchronous>, transform_indices = @transform_3, window_bounds = array<i64: 128, 128>}, {pipeline_mode = #tpu.pipeline_mode<synchronous>, transform_indices = @transform_4, window_bounds = array<i64: 1, 128>}, {pipeline_mode = #tpu.pipeline_mode<synchronous>, transform_indices = @transform_5, window_bounds = array<i64: 1, 128>}, {pipeline_mode = #tpu.pipeline_mode<synchronous>, transform_indices = @transform_6, window_bounds = array<i64: 1, 128>}, {pipeline_mode = #tpu.pipeline_mode<synchronous>, transform_indices = @transform_7, window_bounds = array<i64: 512, 128>}]} {
    %c0 = arith.constant 0 : index
    %c0_0 = arith.constant 0 : index
    %0 = vector.load %arg1[%c0, %c0_0] : memref<256x128xf32, #tpu.memory_space<vmem>>, vector<256x128xf32>
    %c0_1 = arith.constant 0 : index
    %c0_2 = arith.constant 0 : index
    %1 = vector.load %arg2[%c0_1, %c0_2] : memref<128x128xf32, #tpu.memory_space<vmem>>, vector<128x128xf32>
    %cst = arith.constant dense<0.000000e+00> : vector<256x128xf32>
    %2 = tpu.matmul %0, %1, %cst {dimension_numbers = #tpu.dot_dimension_numbers<[1], [0], [0], [1], [0, 0, 1, 1], [], []>} : vector<256x128xf32>, vector<128x128xf32>, vector<256x128xf32> -> vector<256x128xf32>
    %c0_3 = arith.constant 0 : index
    %c0_4 = arith.constant 0 : index
    %3 = vector.load %arg3[%c0_3, %c0_4] : memref<1x128xf32, #tpu.memory_space<vmem>>, vector<1x128xf32>
    %4 = vector.broadcast %3 : vector<1x128xf32> to vector<256x128xf32>
    %5 = arith.addf %2, %4 : vector<256x128xf32>
    %cst_5 = arith.constant 0.000000e+00 : f32
    %6 = vector.broadcast %cst_5 : f32 to vector<256x128xf32>
    %7 = arith.maximumf %5, %6 : vector<256x128xf32>
    %c0_6 = arith.constant 0 : index
    %c0_7 = arith.constant 0 : index
    %8 = vector.load %arg4[%c0_6, %c0_7] : memref<128x128xf32, #tpu.memory_space<vmem>>, vector<128x128xf32>
    %cst_8 = arith.constant dense<0.000000e+00> : vector<256x128xf32>
    %9 = tpu.matmul %7, %8, %cst_8 {dimension_numbers = #tpu.dot_dimension_numbers<[1], [0], [0], [1], [0, 0, 1, 1], [], []>} : vector<256x128xf32>, vector<128x128xf32>, vector<256x128xf32> -> vector<256x128xf32>
    %c0_9 = arith.constant 0 : index
    %c0_10 = arith.constant 0 : index
    %10 = vector.load %arg5[%c0_9, %c0_10] : memref<1x128xf32, #tpu.memory_space<vmem>>, vector<1x128xf32>
    %11 = vector.broadcast %10 : vector<1x128xf32> to vector<256x128xf32>
    %12 = arith.addf %9, %11 : vector<256x128xf32>
    %cst_11 = arith.constant 0.000000e+00 : f32
    %13 = vector.broadcast %cst_11 : f32 to vector<256x128xf32>
    %14 = arith.maximumf %12, %13 : vector<256x128xf32>
    %c256_i32 = arith.constant 256 : i32
    %15 = arith.muli %arg0, %c256_i32 : i32
    %16 = tpu.assume_multiple %15, 256 : i32
    %17 = arith.index_cast %16 : i32 to index
    %c0_12 = arith.constant 0 : index
    %18 = vector.load %arg8[%17, %c0_12] : memref<512x128xf32, #tpu.memory_space<vmem>>, vector<256x128xf32>
    tpu.vector_store %arg8[%17, %c0_12], %14 {strides = array<i32>} : memref<512x128xf32, #tpu.memory_space<vmem>>, vector<256x128xf32>,
    %c0_i32 = arith.constant 0 : i32
    %19 = arith.cmpi eq, %arg0, %c0_i32 : i32
    %20 = arith.extui %19 : i1 to i32
    %c0_i32_13 = arith.constant 0 : i32
    %21 = arith.cmpi ne, %20, %c0_i32_13 : i32
    scf.if %21 {
      %cst_25 = arith.constant 0.000000e+00 : f32
      %36 = vector.broadcast %cst_25 : f32 to vector<1x128xf32>
      %c0_26 = arith.constant 0 : index
      %c0_27 = arith.constant 0 : index
      %37 = vector.load %arg9[%c0_26, %c0_27] : memref<1x128xf32, #tpu.memory_space<vmem>>, vector<1x128xf32>
      tpu.vector_store %arg9[%c0_26, %c0_27], %36 {strides = array<i32>} : memref<1x128xf32, #tpu.memory_space<vmem>>, vector<1x128xf32>,
      %cst_28 = arith.constant 0.000000e+00 : f32
      %38 = vector.broadcast %cst_28 : f32 to vector<1x128xf32>
      %c0_29 = arith.constant 0 : index
      %c0_30 = arith.constant 0 : index
      %39 = vector.load %arg10[%c0_29, %c0_30] : memref<1x128xf32, #tpu.memory_space<vmem>>, vector<1x128xf32>
      tpu.vector_store %arg10[%c0_29, %c0_30], %38 {strides = array<i32>} : memref<1x128xf32, #tpu.memory_space<vmem>>, vector<1x128xf32>,
    } else {
    }
    %c0_14 = arith.constant 0 : index
    %c0_15 = arith.constant 0 : index
    %22 = vector.load %arg9[%c0_14, %c0_15] : memref<1x128xf32, #tpu.memory_space<vmem>>, vector<1x128xf32>
    %cst_16 = arith.constant dense<0.000000e+00> : vector<128xf32>
    %23 = vector.multi_reduction <add>, %14, %cst_16 [0] : vector<256x128xf32> to vector<128xf32>
    %24 = vector.shape_cast %23 : vector<128xf32> to vector<1x128xf32>
    %25 = arith.addf %22, %24 : vector<1x128xf32>
    %c0_17 = arith.constant 0 : index
    %c0_18 = arith.constant 0 : index
    %26 = vector.load %arg9[%c0_17, %c0_18] : memref<1x128xf32, #tpu.memory_space<vmem>>, vector<1x128xf32>
    tpu.vector_store %arg9[%c0_17, %c0_18], %25 {strides = array<i32>} : memref<1x128xf32, #tpu.memory_space<vmem>>, vector<1x128xf32>,
    %c0_19 = arith.constant 0 : index
    %c0_20 = arith.constant 0 : index
    %27 = vector.load %arg10[%c0_19, %c0_20] : memref<1x128xf32, #tpu.memory_space<vmem>>, vector<1x128xf32>
    %28 = arith.mulf %14, %14 : vector<256x128xf32>
    %cst_21 = arith.constant dense<0.000000e+00> : vector<128xf32>
    %29 = vector.multi_reduction <add>, %28, %cst_21 [0] : vector<256x128xf32> to vector<128xf32>
    %30 = vector.shape_cast %29 : vector<128xf32> to vector<1x128xf32>
    %31 = arith.addf %27, %30 : vector<1x128xf32>
    %c0_22 = arith.constant 0 : index
    %c0_23 = arith.constant 0 : index
    %32 = vector.load %arg10[%c0_22, %c0_23] : memref<1x128xf32, #tpu.memory_space<vmem>>, vector<1x128xf32>
    tpu.vector_store %arg10[%c0_22, %c0_23], %31 {strides = array<i32>} : memref<1x128xf32, #tpu.memory_space<vmem>>, vector<1x128xf32>,
    %c1_i32 = arith.constant 1 : i32
    %33 = arith.cmpi eq, %arg0, %c1_i32 : i32
    %34 = arith.extui %33 : i1 to i32
    %c0_i32_24 = arith.constant 0 : i32
    %35 = arith.cmpi ne, %34, %c0_i32_24 : i32
    scf.if %35 {
      %c0_25 = arith.constant 0 : index
      %c0_26 = arith.constant 0 : index
      %36 = vector.load %arg9[%c0_25, %c0_26] : memref<1x128xf32, #tpu.memory_space<vmem>>, vector<1x128xf32>
      %cst_27 = arith.constant 5.120000e+02 : f32
      %37 = vector.broadcast %cst_27 : f32 to vector<1x128xf32>
      %38 = arith.divf %36, %37 : vector<1x128xf32>
      %c0_28 = arith.constant 0 : index
      %c0_29 = arith.constant 0 : index
      %39 = vector.load %arg10[%c0_28, %c0_29] : memref<1x128xf32, #tpu.memory_space<vmem>>, vector<1x128xf32>
      %cst_30 = arith.constant 5.120000e+02 : f32
      %40 = vector.broadcast %cst_30 : f32 to vector<1x128xf32>
      %41 = arith.divf %39, %40 : vector<1x128xf32>
      %42 = arith.mulf %38, %38 : vector<1x128xf32>
      %43 = arith.subf %41, %42 : vector<1x128xf32>
      %cst_31 = arith.constant 9.99999974E-6 : f32
      %44 = vector.broadcast %cst_31 : f32 to vector<1x128xf32>
      %45 = arith.addf %43, %44 : vector<1x128xf32>
      %46 = math.rsqrt %45 : vector<1x128xf32>
      %c0_32 = arith.constant 0 : index
      %c0_33 = arith.constant 0 : index
      %47 = vector.load %arg6[%c0_32, %c0_33] : memref<1x128xf32, #tpu.memory_space<vmem>>, vector<1x128xf32>
      %48 = arith.mulf %47, %46 : vector<1x128xf32>
      %c0_34 = arith.constant 0 : index
      %c0_35 = arith.constant 0 : index
      %49 = vector.load %arg7[%c0_34, %c0_35] : memref<1x128xf32, #tpu.memory_space<vmem>>, vector<1x128xf32>
      %50 = arith.mulf %38, %48 : vector<1x128xf32>
      %51 = arith.subf %49, %50 : vector<1x128xf32>
      %c0_36 = arith.constant 0 : index
      %c0_37 = arith.constant 0 : index
      %52 = vector.load %arg8[%c0_36, %c0_37] : memref<512x128xf32, #tpu.memory_space<vmem>>, vector<512x128xf32>
      %53 = vector.broadcast %48 : vector<1x128xf32> to vector<512x128xf32>
      %54 = arith.mulf %52, %53 : vector<512x128xf32>
      %55 = vector.broadcast %51 : vector<1x128xf32> to vector<512x128xf32>
      %56 = arith.addf %54, %55 : vector<512x128xf32>
      %c0_38 = arith.constant 0 : index
      %c0_39 = arith.constant 0 : index
      %57 = vector.load %arg8[%c0_38, %c0_39] : memref<512x128xf32, #tpu.memory_space<vmem>>, vector<512x128xf32>
      tpu.vector_store %arg8[%c0_38, %c0_39], %56 {strides = array<i32>} : memref<512x128xf32, #tpu.memory_space<vmem>>, vector<512x128xf32>,
    } else {
    }
    return
  }
  func.func @transform_0(%arg0: i32) -> (i32, i32) {
    %c0_i32 = arith.constant 0 : i32
    %c0_i32_0 = arith.constant 0 : i32
    return %arg0, %c0_i32 : i32, i32
  }
  func.func @transform_1(%arg0: i32) -> (i32, i32) {
    %c0_i32 = arith.constant 0 : i32
    %c0_i32_0 = arith.constant 0 : i32
    %c0_i32_1 = arith.constant 0 : i32
    return %c0_i32, %c0_i32_0 : i32, i32
  }
  func.func @transform_2(%arg0: i32) -> (i32, i32) {
    %c0_i32 = arith.constant 0 : i32
    %c0_i32_0 = arith.constant 0 : i32
    %c0_i32_1 = arith.constant 0 : i32
    return %c0_i32, %c0_i32_0 : i32, i32
  }
  func.func @transform_3(%arg0: i32) -> (i32, i32) {
    %c0_i32 = arith.constant 0 : i32
    %c0_i32_0 = arith.constant 0 : i32
    %c0_i32_1 = arith.constant 0 : i32
    return %c0_i32, %c0_i32_0 : i32, i32
  }
  func.func @transform_4(%arg0: i32) -> (i32, i32) {
    %c0_i32 = arith.constant 0 : i32
    %c0_i32_0 = arith.constant 0 : i32
    %c0_i32_1 = arith.constant 0 : i32
    return %c0_i32, %c0_i32_0 : i32, i32
  }
  func.func @transform_5(%arg0: i32) -> (i32, i32) {
    %c0_i32 = arith.constant 0 : i32
    %c0_i32_0 = arith.constant 0 : i32
    %c0_i32_1 = arith.constant 0 : i32
    return %c0_i32, %c0_i32_0 : i32, i32
  }
  func.func @transform_6(%arg0: i32) -> (i32, i32) {
    %c0_i32 = arith.constant 0 : i32
    %c0_i32_0 = arith.constant 0 : i32
    %c0_i32_1 = arith.constant 0 : i32
    return %c0_i32, %c0_i32_0 : i32, i32
  }
  func.func @transform_7(%arg0: i32) -> (i32, i32) {
    %c0_i32 = arith.constant 0 : i32
    %c0_i32_0 = arith.constant 0 : i32
    %c0_i32_1 = arith.constant 0 : i32
    return %c0_i32, %c0_i32_0 : i32, i32
  }
}

</mosaic_0001>

<bundles_post_ra>
// kernel: tpu_custom_call.1
= control target key start
LH: loop header
LB: loop body
LE: loop exit
PB: predicated region body
PF: predicated region fallthrough
CT: control target
= control target key end

     0   :  { %12 = vsyncpa [#allocation5], 0  ;;  %s2604_s0 = inlined_call_operand.hbm [shape: f32[512,128], index: 0, kind: input, shape index: {}]   ;;  %s2605_s1 = inlined_call_operand.hbm [shape: f32[128,128], index: 1, kind: input, shape index: {}]   ;;  %s2606_s2 = inlined_call_operand.vmem [shape: f32[1,128], index: 2, kind: input, shape index: {}]   ;;  %s2607_s3 = inlined_call_operand.hbm [shape: f32[128,128], index: 3, kind: input, shape index: {}]   ;;  %s2608_s4 = inlined_call_operand.vmem [shape: f32[1,128], index: 4, kind: input, shape index: {}]   ;;  %s2609_s5 = inlined_call_operand.vmem [shape: f32[1,128], index: 5, kind: input, shape index: {}]   ;;  %s2610_s6 = inlined_call_operand.vmem [shape: f32[1,128], index: 6, kind: input, shape index: {}]   ;;  %s2611_s7 = inlined_call_operand.hbm [shape: f32[512,128], index: 7, kind: output, shape index: {}]  }
   0x1   :  { %14 = vsyncpa [#allocation5 + $0x1], 0 }
   0x2   :  { %15 = vsyncpa [#allocation8], 0 }
   0x3   :  { %16 = vsyncpa [#allocation6], 0  ;;  %s1974_s24 = smov 0   ;;  %s1976_s25 = smov 0  }
   0x4   :  { %s1978_s26 = smov 0   ;;  %s1980_s27 = smov 0  }
   0x5 LB: > { %s1993_s28 = sadd.s32 4294967295, %s1923_s27   ;;  %p42_p0 = scmp.ne.s32.totalorder %s1915_s25, %s1911_s24  ;;  %s1923_s27 = sphi %s1980_s27, %s2627_s27   ;;  %s1919_s26 = sphi %s1978_s26, %s2626_s26   ;;  %s1915_s25 = sphi %s1976_s25, %s2625_s25   ;;  %s1911_s24 = sphi %s1974_s24, %s2624_s24  }
   0x6   : > { %p2612_p1 = scmp.eq.s32.totalorder %s1993_s28, 0  ;;  %p1426_p2 = scmp.ge.s32.totalorder %s1923_s27, 1 }
   0x7   : > { %p200_p3 = scmp.lt.s32.totalorder %s1923_s27, 3  ;;  %s1925_s8 = smov [#allocation7]  }
   0x8   : > { %p2002_p5 = por %p2612_p1, %p42_p0  ;;  %s212_s9 = sshll.u32 %s1925_s8, 4  ;;  %s213_s9 = int_to_ptr.vmem [resolvable:$true] %s212_s9 }
   0x9   : > { %p2006_p6 = pnand %p1426_p2, %p200_p3  ;;  %s1926_s11 = smov [#allocation9]  }
   0xa   : > { %s2615_s29 = scalar_select %p2002_p5, 1, 0 }
   0xb   : > { %s2616_s30 = scalar_select %p2006_p6, 1, 0 }
   0xc   : > { %p1717_p7 = pneg %p2006_p6  ;;  %s228_s12 = sshll.u32 %s1926_s11, 4  ;;  %s229_s12 = int_to_ptr.vmem [resolvable:$true] %s228_s12 }
   0xd   : > { %s1788_s13 = scalar_lea.vmem %s213_s9, 2048  ;;  %p1796_p13 = scmp.lt.s32.totalorder %s213_s9, %s213_s9 }
   0xe   : > { %p2014_p8 = pnand %p1717_p7, %p2612_p1  ;;  %p1789_p10 = scmp.ne.s32.totalorder %s213_s9, %s1788_s13 }
   0xf   : > { %p1797_p0 = scmp.lt.s32.totalorder %s1788_s13, %s1788_s13 }
  0x10   : > { %p1779_p9 = pneg %p2014_p8 }
  0x11   : > { %p1798_p2 = por %p1797_p0, %p1796_p13 }
  0x12   : > { %p1791_p11 = pnand %p1789_p10, %p1779_p9 }
  0x14   : > { %p1792_p12 = pneg %p1791_p11 }
  0x16   : > { %p1799_p3 = pnand %p1798_p2, %p1792_p12 }
  0x18   : > { %1802 = shalt.err (!%p1799_p3)
}
  0x19   : > { %s1927_s14 = smov 128   ;;  %s1928_s15 = smov 8  }
  0x1a   : > { %1720 = dma.hbm_to_vmem [thread:$0]  (!%p2014_p8), %s2605_s1, 2048, %s213_s9, [#allocation8], %s1927_s14, %s1927_s14, %s1928_s15  }
  0x1b   : > { %s1814_s18 = scalar_lea.vmem %s229_s12, 2048  ;;  %p1822_p12 = scmp.lt.s32.totalorder %s229_s12, %s229_s12 }
  0x1c   : > { %p1815_p7 = scmp.ne.s32.totalorder %s229_s12, %s1814_s18  ;;  %p1823_p13 = scmp.lt.s32.totalorder %s1814_s18, %s1814_s18 }
  0x1e   : > { %p1817_p10 = pnand %p1815_p7, %p1779_p9  ;;  %p1824_p0 = por %p1823_p13, %p1822_p12 }
  0x20   : > { %p1818_p11 = pneg %p1817_p10 }
  0x22   : > { %p1825_p2 = pnand %p1824_p0, %p1818_p11 }
  0x24   : > { %1828 = shalt.err (!%p1825_p2)
}
  0x25   : > { %1723 = dma.hbm_to_vmem [thread:$0]  (!%p2014_p8), %s2607_s3, 2048, %s229_s12, [#allocation8], %s1927_s14, %s1927_s14, %s1928_s15  }
  0x26   : > { %s2043_s21 = sadd.s32 1, %s1923_s27   ;;  %s29_s22 = sadd.s32 1, %s1919_s26 }
  0x27   : > { %s26_s23 = ssub.s32 %s1923_s27, %s2043_s21  ;;  %p36_p9 = scmp.ne.s32.totalorder %s1919_s26, %s1915_s25 }
  0x28   : > { %p27_p3 = scmp.eq.s32.totalorder %s26_s23, 0  ;;  %p37_p7 = scmp.eq.s32.totalorder %s1923_s27, 0 }
  0x29   : > { %p1730_p10 = scmp.lt.s32.totalorder %s1923_s27, 2  ;;  %s251_s24 = sand.u32 1, %s1919_s26  }
  0x2a   : > { %s2054_s8 = scalar_select %p27_p3, %s1919_s26, %s29_s22  }
  0x2b   : > { %p38_p11 = por %p37_p7, %p36_p9  ;;  %s1430_s9 = sshll.u32 %s251_s24, 8 }
  0x2c   : > { %s1446_s10 = sshll.u32 %s1923_s27, 12  ;;  %s255_s12 = scalar_lea.vmem [#allocation4], %s1430_s9 }
  0x2d   : > { %s2060_s16 = scalar_lea.hbm %s2604_s0, %s1446_s10  ;;  %s262_s17 = sshll.u32 %s255_s12, 4  ;;  %s2066_s17 = int_to_ptr.vmem [resolvable:$true] %s262_s17 }
  0x2e   : > { %p2062_p8 = pnand %p1730_p10, %p38_p11  ;;  %s2068_s19 = scalar_lea.sflag [#allocation5], %s251_s24 }
  0x2f   : > { %s1829_s27 = scalar_lea.hbm %s2060_s16, 4096  ;;  %s1834_s23 = scalar_lea.hbm %s2604_s0, 8192 }
  0x30   : > { %p1830_p12 = scmp.ne.s32.totalorder %s2060_s16, %s1829_s27  ;;  %p1831_p13 = pneg %p2062_p8 }
  0x31   : > { %p1835_p9 = scmp.lt.s32.totalorder %s2060_s16, %s2604_s0  ;;  %p1836_p3 = scmp.lt.s32.totalorder %s1834_s23, %s1829_s27 }
  0x32   : > { %p1832_p0 = pnand %p1831_p13, %p1830_p12 }
  0x33   : > { %p1837_p7 = por %p1836_p3, %p1835_p9 }
  0x34   : > { %p1833_p2 = pneg %p1832_p0 }
  0x36   : > { %p1838_p10 = pnand %p1837_p7, %p1833_p2 }
  0x38   : > { %1841 = shalt.err (!%p1838_p10)
}
  0x39   : > { %s1842_s24 = scalar_lea.vmem %s2066_s17, 4096  ;;  %s1929_s11 = smov [#allocation4]  }
  0x3a   : > { %p1843_p11 = scmp.ne.s32.totalorder %s2066_s17, %s1842_s24  ;;  %s1847_s13 = sshll.u32 %s1929_s11, 4  ;;  %s1848_s13 = int_to_ptr.vmem [resolvable:$false] %s1847_s13 }
  0x3b   : > { %s1849_s12 = scalar_lea.vmem %s1848_s13, 8192  ;;  %p1850_p0 = scmp.lt.s32.totalorder %s2066_s17, %s1848_s13 }
  0x3c   : > { %p1845_p4 = pnand %p1843_p11, %p1831_p13  ;;  %p1851_p1 = scmp.lt.s32.totalorder %s1849_s12, %s1842_s24 }
  0x3e   : > { %p1846_p12 = pneg %p1845_p4  ;;  %p1852_p5 = por %p1851_p1, %p1850_p0 }
  0x40   : > { %p1853_p6 = pnand %p1852_p5, %p1846_p12 }
  0x42   : > { %1856 = shalt.err (!%p1853_p6)
}
  0x43   : > { %1727 = dma.hbm_to_vmem [thread:$0]  (!%p2062_p8), %s2060_s16, 4096, %s2066_s17, %s2068_s19, %s1927_s14, %s1927_s14, %s1928_s15  }
  0x44   : > { %p2619_p4 = scmp.ne.s32.totalorder %s2616_s30, 0 }
  0x45   : > { %s276_s27 = sand.u32 (!%p2619_p4), 1, %s1915_s25   ;;  %p2620_p1 = scmp.ne.s32.totalorder (!%p2619_p4), %s2615_s29, 0 }
  0x46   : > { %274 = sbr.rel (%p2619_p4) target bundleno = 743 (0x2e7), region = 48  ;;  %s1434_s20 = sshll.u32 (!%p2619_p4), %s276_s27, 8 }
  0x47   : > { %s277_s22 = scalar_lea.sflag (!%p2619_p4), [#allocation5], %s276_s27  ;;  %s2095_s23 = scalar_lea.vmem (!%p2619_p4), [#allocation4], %s1434_s20 }
  0x4b   : > { %1898 = dma.done.wait (%p2620_p1), %s277_s22, 4096  }
  0x4c   : > { %1900 = vsyncadd (%p2620_p1), %s277_s22, 4294963200  ;;  %p2621_p5 = scmp.eq.s32.totalorder %s1993_s28, 0 }
  0x4e   : > { %1902 = dma.done.wait (%p2621_p5), [#allocation8], 4096   ;;  %p2622_p6 = pmov %p2621_p5 }
  0x4f   : > { %v362_v0 = vld [vmem:[#allocation7 + $0x78] sm:$0xff]  ;;  %v361_v1 = vld [vmem:[#allocation7 + $0x70] sm:$0xff]  ;;  %v360_v2 = vld [vmem:[#allocation7 + $0x68] sm:$0xff]  ;;  %s1439_s16 = sshll.u32 %s1993_s28, 8  ;;  %p2623_p8 = scmp.ne.s32.totalorder %s1993_s28, 0 }
  0x50   : > { %1904 = vsyncadd (%p2622_p6), [#allocation8], 4294963200  ;;  %1543 = vmatprep.subr.mxu0 %v362_v0  ;;  %v359_v3 = vld [vmem:[#allocation7 + $0x60] sm:$0xff]  ;;  %v358_v5 = vld [vmem:[#allocation7 + $0x58] sm:$0xff]  ;;  %s2184_s17 = scalar_lea.vmem [#allocation10], %s1439_s16 }
  0x51   : > { %1544 = vmatpush3.msra.mxu0 %v362_v0  ;;  %v315_v4 = vld [vmem:[%s2095_s23] sm:$0xff]  ;;  %v357_v6 = vld [vmem:[#allocation7 + $0x50] sm:$0xff]  ;;  %v356_v7 = vld [vmem:[#allocation7 + $0x48] sm:$0xff] }
  0x52   : > { %1545 = vmatprep.subr.mxu0 %v361_v1  ;;  %1575 = vmatprep.mubr.f32.mxu0 %v315_v4  ;;  %v355_v8 = vld [vmem:[#allocation7 + $0x40] sm:$0xff]  ;;  %v354_v9 = vld [vmem:[#allocation7 + $0x38] sm:$0xff]  ;;  %v353_v10 = vld [vmem:[#allocation7 + $0x30] sm:$0xff] }
  0x53   : > { %1546 = vmatpush3.msra.mxu0 %v361_v1  ;;  %v642_v11 = vld [vmem:[#allocation9 + $0x78] sm:$0xff]  ;;  %v641_v12 = vld [vmem:[#allocation9 + $0x70] sm:$0xff]  ;;  %v352_v13 = vld [vmem:[#allocation7 + $0x28] sm:$0xff] }
  0x54   : > { %1547 = vmatprep.subr.mxu0 %v360_v2  ;;  %1623 = vmatprep.subr.mxu1 %v642_v11  ;;  %v640_v14 = vld [vmem:[#allocation9 + $0x68] sm:$0xff]  ;;  %v351_v15 = vld [vmem:[#allocation7 + $0x20] sm:$0xff]  ;;  %v350_v17 = vld [vmem:[#allocation7 + $0x18] sm:$0xff] }
  0x55   : > { %1548 = vmatpush3.msra.mxu0 %v360_v2  ;;  %1624 = vmatpush3.msra.mxu1 %v642_v11  ;;  %v639_v16 = vld [vmem:[#allocation9 + $0x60] sm:$0xff]  ;;  %v638_v18 = vld [vmem:[#allocation9 + $0x58] sm:$0xff]  ;;  %v349_v19 = vld [vmem:[#allocation7 + $0x10] sm:$0xff] }
  0x56   : > { %1549 = vmatprep.subr.mxu0 %v359_v3  ;;  %1625 = vmatprep.subr.mxu1 %v641_v12  ;;  %v637_v20 = vld [vmem:[#allocation9 + $0x50] sm:$0xff]  ;;  %v348_v21 = vld [vmem:[#allocation7 + $0x8] sm:$0xff]  ;;  %v347_v23 = vld [vmem:[#allocation7] sm:$0xff] }
  0x57   : > { %1550 = vmatpush3.msra.mxu0 %v359_v3  ;;  %1626 = vmatpush3.msra.mxu1 %v641_v12  ;;  %v636_v22 = vld [vmem:[#allocation9 + $0x48] sm:$0xff]  ;;  %v635_v24 = vld [vmem:[#allocation9 + $0x40] sm:$0xff]  ;;  %v634_v26 = vld [vmem:[#allocation9 + $0x38] sm:$0xff] }
  0x58   : > { %1551 = vmatprep.subr.mxu0 %v358_v5  ;;  %1627 = vmatprep.subr.mxu1 %v640_v14  ;;  %v316_v25 = vld [vmem:[%s2095_s23 + $0x8] sm:$0xff]  ;;  %v317_v27 = vld [vmem:[%s2095_s23 + $0x10] sm:$0xff]  ;;  %v318_v29 = vld [vmem:[%s2095_s23 + $0x18] sm:$0xff] }
  0x59   : > { %1552 = vmatpush3.msra.mxu0 %v358_v5  ;;  %1628 = vmatpush3.msra.mxu1 %v640_v14  ;;  %v633_v28 = vld [vmem:[#allocation9 + $0x30] sm:$0xff]  ;;  %v632_v30 = vld [vmem:[#allocation9 + $0x28] sm:$0xff]  ;;  %v319_v31 = vld [vmem:[%s2095_s23 + $0x20] sm:$0xff] }
  0x5a   : > { %1553 = vmatprep.subr.mxu0 %v357_v6  ;;  %1629 = vmatprep.subr.mxu1 %v639_v16  ;;  %v631_v32 = vld [vmem:[#allocation9 + $0x20] sm:$0xff]  ;;  %v320_v33 = vld [vmem:[%s2095_s23 + $0x28] sm:$0xff]  ;;  %v321_v34 = vld [vmem:[%s2095_s23 + $0x30] sm:$0xff] }
  0x5b   : > { %1554 = vmatpush3.msra.mxu0 %v357_v6  ;;  %1630 = vmatpush3.msra.mxu1 %v639_v16  ;;  %v322_v35 = vld [vmem:[%s2095_s23 + $0x38] sm:$0xff]  ;;  %v323_v36 = vld [vmem:[%s2095_s23 + $0x40] sm:$0xff]  ;;  %v324_v37 = vld [vmem:[%s2095_s23 + $0x48] sm:$0xff] }
  0x5c   : > { %1555 = vmatprep.subr.mxu0 %v356_v7  ;;  %1631 = vmatprep.subr.mxu1 %v638_v18  ;;  %v325_v38 = vld [vmem:[%s2095_s23 + $0x50] sm:$0xff]  ;;  %v326_v39 = vld [vmem:[%s2095_s23 + $0x58] sm:$0xff]  ;;  %v327_v40 = vld [vmem:[%s2095_s23 + $0x60] sm:$0xff] }
  0x5d   : > { %1556 = vmatpush3.msra.mxu0 %v356_v7  ;;  %1632 = vmatpush3.msra.mxu1 %v638_v18  ;;  %v328_v41 = vld [vmem:[%s2095_s23 + $0x68] sm:$0xff]  ;;  %v329_v42 = vld [vmem:[%s2095_s23 + $0x70] sm:$0xff]  ;;  %v330_v43 = vld [vmem:[%s2095_s23 + $0x78] sm:$0xff] }
  0x5e   : > { %1557 = vmatprep.subr.mxu0 %v355_v8  ;;  %1633 = vmatprep.subr.mxu1 %v637_v20  ;;  %v331_v44 = vld [vmem:[%s2095_s23 + $0x80] sm:$0xff]  ;;  %v332_v45 = vld [vmem:[%s2095_s23 + $0x88] sm:$0xff]  ;;  %v333_v46 = vld [vmem:[%s2095_s23 + $0x90] sm:$0xff] }
  0x5f   : > { %1558 = vmatpush3.msra.mxu0 %v355_v8  ;;  %1634 = vmatpush3.msra.mxu1 %v637_v20  ;;  %v334_v47 = vld [vmem:[%s2095_s23 + $0x98] sm:$0xff]  ;;  %v335_v48 = vld [vmem:[%s2095_s23 + $0xa0] sm:$0xff]  ;;  %v336_v49 = vld [vmem:[%s2095_s23 + $0xa8] sm:$0xff] }
  0x60   : > { %1559 = vmatprep.subr.mxu0 %v354_v9  ;;  %1635 = vmatprep.subr.mxu1 %v636_v22  ;;  %v337_v50 = vld [vmem:[%s2095_s23 + $0xb0] sm:$0xff]  ;;  %v338_v51 = vld [vmem:[%s2095_s23 + $0xb8] sm:$0xff]  ;;  %v339_v52 = vld [vmem:[%s2095_s23 + $0xc0] sm:$0xff] }
  0x61   : > { %1560 = vmatpush3.msra.mxu0 %v354_v9  ;;  %1636 = vmatpush3.msra.mxu1 %v636_v22  ;;  %v340_v53 = vld [vmem:[%s2095_s23 + $0xc8] sm:$0xff]  ;;  %v341_v54 = vld [vmem:[%s2095_s23 + $0xd0] sm:$0xff]  ;;  %v342_v55 = vld [vmem:[%s2095_s23 + $0xd8] sm:$0xff] }
  0x62   : > { %1561 = vmatprep.subr.mxu0 %v353_v10  ;;  %1637 = vmatprep.subr.mxu1 %v635_v24  ;;  %v343_v56 = vld [vmem:[%s2095_s23 + $0xe0] sm:$0xff]  ;;  %v344_v57 = vld [vmem:[%s2095_s23 + $0xe8] sm:$0xff]  ;;  %v345_v58 = vld [vmem:[%s2095_s23 + $0xf0] sm:$0xff] }
  0x63   : > { %1562 = vmatpush3.msra.mxu0 %v353_v10  ;;  %1638 = vmatpush3.msra.mxu1 %v635_v24  ;;  %v346_v59 = vld [vmem:[%s2095_s23 + $0xf8] sm:$0xff]  ;;  %v629_v61 = vld [vmem:[#allocation9 + $0x10] sm:$0xff]  ;;  %v628_v62 = vld [vmem:[#allocation9 + $0x8] sm:$0xff] }
  0x64   : > { %1563 = vmatprep.subr.mxu0 %v352_v13  ;;  %1639 = vmatprep.subr.mxu1 %v634_v26  ;;  %v630_v60 = vld [vmem:[#allocation9 + $0x18] sm:$0xff]  ;;  %v627_v63 = vld [vmem:[#allocation9] sm:$0xff] }
  0x65   : > { %1564 = vmatpush3.msra.mxu0 %v352_v13  ;;  %1640 = vmatpush3.msra.mxu1 %v634_v26  ;;  %v2140_v0 = vld [vmem:[%s2606_s2] ss:$0 sm:$0xff] }
  0x66   : > { %1565 = vmatprep.subr.mxu0 %v351_v15  ;;  %1641 = vmatprep.subr.mxu1 %v633_v28 }
  0x67   : > { %1566 = vmatpush3.msra.mxu0 %v351_v15  ;;  %1642 = vmatpush3.msra.mxu1 %v633_v28 }
  0x68   : > { %1567 = vmatprep.subr.mxu0 %v350_v17  ;;  %1643 = vmatprep.subr.mxu1 %v632_v30 }
  0x69   : > { %1568 = vmatpush3.msra.mxu0 %v350_v17  ;;  %1644 = vmatpush3.msra.mxu1 %v632_v30 }
  0x6a   : > { %1569 = vmatprep.subr.mxu0 %v349_v19  ;;  %1645 = vmatprep.subr.mxu1 %v631_v32 }
  0x6b   : > { %1570 = vmatpush3.msra.mxu0 %v349_v19  ;;  %1646 = vmatpush3.msra.mxu1 %v631_v32 }
  0x6c   : > { %1571 = vmatprep.subr.mxu0 %v348_v21  ;;  %1647 = vmatprep.subr.mxu1 %v630_v60 }
  0x6d   : > { %1572 = vmatpush3.msra.mxu0 %v348_v21  ;;  %1648 = vmatpush3.msra.mxu1 %v630_v60 }
  0x6e   : > { %1573 = vmatprep.subr.mxu0 %v347_v23  ;;  %1649 = vmatprep.subr.mxu1 %v629_v61 }
  0x6f   : > { %1574 = vmatpush3.msra.mxu0 %v347_v23  ;;  %1650 = vmatpush3.msra.mxu1 %v629_v61 }
  0x70   : > { %1576 = vmatmul.mubr.f32.vlgmr.msra.gmra.mxu0 %v316_v25  ;;  %1651 = vmatprep.subr.mxu1 %v628_v62 }
  0x71   : > { %1578 = vmatprep.mubr.f32.mxu0 %v317_v27  ;;  %1652 = vmatpush3.msra.mxu1 %v628_v62 }
  0x72   : > { %1653 = vmatprep.subr.mxu1 %v627_v63 }
  0x73   : > { %1654 = vmatpush3.msra.mxu1 %v627_v63 }
  0x74   : > { %1579 = vmatmul.mubr.f32.gmra.mxu0 %v318_v29 }
  0x75   : > { %1581 = vmatprep.mubr.f32.mxu0 %v319_v31 }
  0x78   : > { %1582 = vmatmul.mubr.f32.gmra.mxu0 %v320_v33 }
  0x79   : > { %1584 = vmatprep.mubr.f32.mxu0 %v321_v34 }
  0x7c   : > { %1585 = vmatmul.mubr.f32.gmra.mxu0 %v322_v35 }
  0x7d   : > { %1587 = vmatprep.mubr.f32.mxu0 %v323_v36 }
  0x80   : > { %1588 = vmatmul.mubr.f32.gmra.mxu0 %v324_v37 }
  0x81   : > { %1590 = vmatprep.mubr.f32.mxu0 %v325_v38 }
  0x84   : > { %1591 = vmatmul.mubr.f32.gmra.mxu0 %v326_v39 }
  0x85   : > { %1593 = vmatprep.mubr.f32.mxu0 %v327_v40 }
  0x88   : > { %1594 = vmatmul.mubr.f32.gmra.mxu0 %v328_v41 }
  0x89   : > { %1596 = vmatprep.mubr.f32.mxu0 %v329_v42 }
  0x8c   : > { %1597 = vmatmul.mubr.f32.gmra.mxu0 %v330_v43 }
  0x8d   : > { %1599 = vmatprep.mubr.f32.mxu0 %v331_v44 }
  0x90   : > { %1600 = vmatmul.mubr.f32.gmra.mxu0 %v332_v45 }
  0x91   : > { %1602 = vmatprep.mubr.f32.mxu0 %v333_v46 }
  0x94   : > { %1603 = vmatmul.mubr.f32.gmra.mxu0 %v334_v47 }
  0x95   : > { %1605 = vmatprep.mubr.f32.mxu0 %v335_v48 }
  0x98   : > { %1606 = vmatmul.mubr.f32.gmra.mxu0 %v336_v49 }
  0x99   : > { %1608 = vmatprep.mubr.f32.mxu0 %v337_v50 }
  0x9c   : > { %1609 = vmatmul.mubr.f32.gmra.mxu0 %v338_v51 }
  0x9d   : > { %1611 = vmatprep.mubr.f32.mxu0 %v339_v52 }
  0xa0   : > { %1612 = vmatmul.mubr.f32.gmra.mxu0 %v340_v53 }
  0xa1   : > { %1614 = vmatprep.mubr.f32.mxu0 %v341_v54 }
  0xa4   : > { %1615 = vmatmul.mubr.f32.gmra.mxu0 %v342_v55 }
  0xa5   : > { %1617 = vmatprep.mubr.f32.mxu0 %v343_v56 }
  0xa8   : > { %1618 = vmatmul.mubr.f32.gmra.mxu0 %v344_v57 }
  0xa9   : > { %1620 = vmatprep.mubr.f32.mxu0 %v345_v58 }
  0xac   : > { %1621 = vmatmul.mubr.f32.gmra.mxu0 %v346_v59 }
 0x130   : > { %v1577_v1 = vpop.f32.mrf.mxu0 }
 0x131   : > { %v442_v2 = vadd.f32 %v1577_v1, %v2140_v0 }
 0x132   : > { %v436_v3 = vpop.f32.mrf.mxu0 }
 0x133   : > { %v437_v4 = vadd.f32 %v2140_v0, %v436_v3  ;;  %v596_v7 = vmax.f32 %v442_v2, 0.0 }
 0x134   : > { %v1580_v5 = vpop.f32.mrf.mxu0 }
 0x135   : > { %v595_v6 = vmax.f32 %v437_v4, 0.0  ;;  %v452_v8 = vadd.f32 %v1580_v5, %v2140_v0 }
 0x136   : > { %v446_v9 = vpop.f32.mrf.mxu0 }
 0x137   : > { %v447_v10 = vadd.f32 %v2140_v0, %v446_v9  ;;  %1655 = vmatprep.mubr.f32.mxu1 %v595_v6  ;;  %v598_v13 = vmax.f32 %v452_v8, 0.0 }
 0x138   : > { %v1583_v11 = vpop.f32.mrf.mxu0  ;;  %1656 = vmatmul.mubr.f32.vlgmr.msra.gmra.mxu1 %v596_v7 }
 0x139   : > { %v597_v12 = vmax.f32 %v447_v10, 0.0  ;;  %v462_v14 = vadd.f32 %v1583_v11, %v2140_v0 }
 0x13a   : > { %v456_v15 = vpop.f32.mrf.mxu0 }
 0x13b   : > { %v457_v16 = vadd.f32 %v2140_v0, %v456_v15  ;;  %1658 = vmatprep.mubr.f32.mxu1 %v597_v12  ;;  %v600_v19 = vmax.f32 %v462_v14, 0.0 }
 0x13c   : > { %v1586_v17 = vpop.f32.mrf.mxu0  ;;  %1659 = vmatmul.mubr.f32.gmra.mxu1 %v598_v13 }
 0x13d   : > { %v599_v18 = vmax.f32 %v457_v16, 0.0  ;;  %v472_v20 = vadd.f32 %v1586_v17, %v2140_v0 }
 0x13e   : > { %v466_v21 = vpop.f32.mrf.mxu0 }
 0x13f   : > { %v467_v22 = vadd.f32 %v2140_v0, %v466_v21  ;;  %1661 = vmatprep.mubr.f32.mxu1 %v599_v18  ;;  %v602_v25 = vmax.f32 %v472_v20, 0.0 }
 0x140   : > { %v1589_v23 = vpop.f32.mrf.mxu0  ;;  %1662 = vmatmul.mubr.f32.gmra.mxu1 %v600_v19 }
 0x141   : > { %v601_v24 = vmax.f32 %v467_v22, 0.0  ;;  %v482_v26 = vadd.f32 %v1589_v23, %v2140_v0 }
 0x142   : > { %v476_v27 = vpop.f32.mrf.mxu0 }
 0x143   : > { %v477_v28 = vadd.f32 %v2140_v0, %v476_v27  ;;  %1664 = vmatprep.mubr.f32.mxu1 %v601_v24  ;;  %v604_v31 = vmax.f32 %v482_v26, 0.0 }
 0x144   : > { %v1592_v29 = vpop.f32.mrf.mxu0  ;;  %1665 = vmatmul.mubr.f32.gmra.mxu1 %v602_v25 }
 0x145   : > { %v603_v30 = vmax.f32 %v477_v28, 0.0  ;;  %v492_v32 = vadd.f32 %v1592_v29, %v2140_v0 }
 0x146   : > { %v486_v33 = vpop.f32.mrf.mxu0 }
 0x147   : > { %v487_v34 = vadd.f32 %v2140_v0, %v486_v33  ;;  %1667 = vmatprep.mubr.f32.mxu1 %v603_v30  ;;  %v606_v37 = vmax.f32 %v492_v32, 0.0 }
 0x148   : > { %v1595_v35 = vpop.f32.mrf.mxu0  ;;  %1668 = vmatmul.mubr.f32.gmra.mxu1 %v604_v31 }
 0x149   : > { %v605_v36 = vmax.f32 %v487_v34, 0.0  ;;  %v502_v38 = vadd.f32 %v1595_v35, %v2140_v0  ;;  %v2177_v34 = vld [vmem:[%s2608_s4] ss:$0 sm:$0xff] }
 0x14a   : > { %v496_v39 = vpop.f32.mrf.mxu0 }
 0x14b   : > { %v497_v40 = vadd.f32 %v2140_v0, %v496_v39  ;;  %1670 = vmatprep.mubr.f32.mxu1 %v605_v36  ;;  %v608_v43 = vmax.f32 %v502_v38, 0.0 }
 0x14c   : > { %v1598_v41 = vpop.f32.mrf.mxu0  ;;  %1671 = vmatmul.mubr.f32.gmra.mxu1 %v606_v37 }
 0x14d   : > { %v607_v42 = vmax.f32 %v497_v40, 0.0  ;;  %v512_v44 = vadd.f32 %v1598_v41, %v2140_v0 }
 0x14e   : > { %v506_v45 = vpop.f32.mrf.mxu0 }
 0x14f   : > { %v507_v46 = vadd.f32 %v2140_v0, %v506_v45  ;;  %1673 = vmatprep.mubr.f32.mxu1 %v607_v42  ;;  %v610_v49 = vmax.f32 %v512_v44, 0.0 }
 0x150   : > { %v1601_v47 = vpop.f32.mrf.mxu0  ;;  %1674 = vmatmul.mubr.f32.gmra.mxu1 %v608_v43 }
 0x151   : > { %v609_v48 = vmax.f32 %v507_v46, 0.0  ;;  %v522_v50 = vadd.f32 %v1601_v47, %v2140_v0 }
 0x152   : > { %v516_v51 = vpop.f32.mrf.mxu0 }
 0x153   : > { %v517_v52 = vadd.f32 %v2140_v0, %v516_v51  ;;  %1676 = vmatprep.mubr.f32.mxu1 %v609_v48  ;;  %v612_v55 = vmax.f32 %v522_v50, 0.0 }
 0x154   : > { %v1604_v53 = vpop.f32.mrf.mxu0  ;;  %1677 = vmatmul.mubr.f32.gmra.mxu1 %v610_v49 }
 0x155   : > { %v611_v54 = vmax.f32 %v517_v52, 0.0  ;;  %v532_v56 = vadd.f32 %v1604_v53, %v2140_v0 }
 0x156   : > { %v526_v57 = vpop.f32.mrf.mxu0 }
 0x157   : > { %v527_v58 = vadd.f32 %v2140_v0, %v526_v57  ;;  %1679 = vmatprep.mubr.f32.mxu1 %v611_v54  ;;  %v614_v61 = vmax.f32 %v532_v56, 0.0 }
 0x158   : > { %v1607_v59 = vpop.f32.mrf.mxu0  ;;  %1680 = vmatmul.mubr.f32.gmra.mxu1 %v612_v55 }
 0x159   : > { %v613_v60 = vmax.f32 %v527_v58, 0.0  ;;  %v542_v62 = vadd.f32 %v1607_v59, %v2140_v0 }
 0x15a   : > { %v536_v63 = vpop.f32.mrf.mxu0 }
 0x15b   : > { %v537_v1 = vadd.f32 %v2140_v0, %v536_v63  ;;  %1682 = vmatprep.mubr.f32.mxu1 %v613_v60  ;;  %v616_v4 = vmax.f32 %v542_v62, 0.0 }
 0x15c   : > { %v1610_v2 = vpop.f32.mrf.mxu0  ;;  %1683 = vmatmul.mubr.f32.gmra.mxu1 %v614_v61 }
 0x15d   : > { %v615_v3 = vmax.f32 %v537_v1, 0.0  ;;  %v552_v5 = vadd.f32 %v1610_v2, %v2140_v0 }
 0x15e   : > { %v546_v6 = vpop.f32.mrf.mxu0 }
 0x15f   : > { %v547_v7 = vadd.f32 %v2140_v0, %v546_v6  ;;  %1685 = vmatprep.mubr.f32.mxu1 %v615_v3  ;;  %v618_v10 = vmax.f32 %v552_v5, 0.0 }
 0x160   : > { %v1613_v8 = vpop.f32.mrf.mxu0  ;;  %1686 = vmatmul.mubr.f32.gmra.mxu1 %v616_v4 }
 0x161   : > { %v617_v9 = vmax.f32 %v547_v7, 0.0  ;;  %v562_v11 = vadd.f32 %v1613_v8, %v2140_v0 }
 0x162   : > { %v556_v12 = vpop.f32.mrf.mxu0 }
 0x163   : > { %v557_v13 = vadd.f32 %v2140_v0, %v556_v12  ;;  %1688 = vmatprep.mubr.f32.mxu1 %v617_v9  ;;  %v620_v16 = vmax.f32 %v562_v11, 0.0 }
 0x164   : > { %v1616_v14 = vpop.f32.mrf.mxu0  ;;  %1689 = vmatmul.mubr.f32.gmra.mxu1 %v618_v10 }
 0x165   : > { %v619_v15 = vmax.f32 %v557_v13, 0.0  ;;  %v572_v17 = vadd.f32 %v1616_v14, %v2140_v0 }
 0x166   : > { %v566_v18 = vpop.f32.mrf.mxu0 }
 0x167   : > { %v567_v19 = vadd.f32 %v2140_v0, %v566_v18  ;;  %1691 = vmatprep.mubr.f32.mxu1 %v619_v15  ;;  %v622_v22 = vmax.f32 %v572_v17, 0.0 }
 0x168   : > { %v1619_v20 = vpop.f32.mrf.mxu0  ;;  %1692 = vmatmul.mubr.f32.gmra.mxu1 %v620_v16 }
 0x169   : > { %v621_v21 = vmax.f32 %v567_v19, 0.0  ;;  %v582_v23 = vadd.f32 %v1619_v20, %v2140_v0 }
 0x16a   : > { %v576_v24 = vpop.f32.mrf.mxu0 }
 0x16b   : > { %v577_v25 = vadd.f32 %v2140_v0, %v576_v24  ;;  %1694 = vmatprep.mubr.f32.mxu1 %v621_v21  ;;  %v624_v28 = vmax.f32 %v582_v23, 0.0 }
 0x16c   : > { %v1622_v26 = vpop.f32.mrf.mxu0  ;;  %1695 = vmatmul.mubr.f32.gmra.mxu1 %v622_v22 }
 0x16d   : > { %v623_v27 = vmax.f32 %v577_v25, 0.0  ;;  %v592_v29 = vadd.f32 %v1622_v26, %v2140_v0 }
 0x16e   : > { %v586_v30 = vpop.f32.mrf.mxu0 }
 0x16f   : > { %v587_v31 = vadd.f32 %v2140_v0, %v586_v30  ;;  %1697 = vmatprep.mubr.f32.mxu1 %v623_v27  ;;  %v626_v33 = vmax.f32 %v592_v29, 0.0 }
 0x170   : > { %1698 = vmatmul.mubr.f32.gmra.mxu1 %v624_v28 }
 0x171   : > { %v625_v32 = vmax.f32 %v587_v31, 0.0 }
 0x173   : > { %1700 = vmatprep.mubr.f32.mxu1 %v625_v32 }
 0x174   : > { %1701 = vmatmul.mubr.f32.gmra.mxu1 %v626_v33 }
 0x1f8   : > { %v1657_v35 = vpop.f32.mrf.mxu1 }
 0x1f9   : > { %v722_v36 = vadd.f32 %v1657_v35, %v2177_v34 }
 0x1fa   : > { %v716_v37 = vpop.f32.mrf.mxu1 }
 0x1fb   : > { %v2181_v38 = vmax.f32 %v722_v36, 0.0  ;;  %v717_v0 = vadd.f32 %v2177_v34, %v716_v37 }
 0x1fc   : > { %v1660_v39 = vpop.f32.mrf.mxu1 }
 0x1fd   : > { %910 = vst [vmem:[%s2184_s17 + $0x8] sm:$0xff] %v2181_v38  ;;  %v2188_v40 = vmax.f32 %v717_v0, 0.0  ;;  %v732_v41 = vadd.f32 %v1660_v39, %v2177_v34 }
 0x1fe   : > { %v726_v42 = vpop.f32.mrf.mxu1 }
 0x1ff   : > { %909 = vst [vmem:[%s2184_s17] sm:$0xff] %v2188_v40  ;;  %v2193_v43 = vmax.f32 %v732_v41, 0.0  ;;  %v727_v44 = vadd.f32 %v2177_v34, %v726_v42 }
 0x200   : > { %v1663_v45 = vpop.f32.mrf.mxu1 }
 0x201   : > { %912 = vst [vmem:[%s2184_s17 + $0x18] sm:$0xff] %v2193_v43  ;;  %v2198_v46 = vmax.f32 %v727_v44, 0.0  ;;  %v742_v47 = vadd.f32 %v1663_v45, %v2177_v34 }
 0x202   : > { %v736_v48 = vpop.f32.mrf.mxu1 }
 0x203   : > { %911 = vst [vmem:[%s2184_s17 + $0x10] sm:$0xff] %v2198_v46  ;;  %v2203_v49 = vmax.f32 %v742_v47, 0.0  ;;  %v737_v50 = vadd.f32 %v2177_v34, %v736_v48 }
 0x204   : > { %v1666_v51 = vpop.f32.mrf.mxu1 }
 0x205   : > { %914 = vst [vmem:[%s2184_s17 + $0x28] sm:$0xff] %v2203_v49  ;;  %v2208_v52 = vmax.f32 %v737_v50, 0.0  ;;  %v752_v53 = vadd.f32 %v1666_v51, %v2177_v34 }
 0x206   : > { %v746_v54 = vpop.f32.mrf.mxu1 }
 0x207   : > { %913 = vst [vmem:[%s2184_s17 + $0x20] sm:$0xff] %v2208_v52  ;;  %v2213_v55 = vmax.f32 %v752_v53, 0.0  ;;  %v747_v56 = vadd.f32 %v2177_v34, %v746_v54 }
 0x208   : > { %v1669_v57 = vpop.f32.mrf.mxu1 }
 0x209   : > { %916 = vst [vmem:[%s2184_s17 + $0x38] sm:$0xff] %v2213_v55  ;;  %v2218_v58 = vmax.f32 %v747_v56, 0.0  ;;  %v762_v59 = vadd.f32 %v1669_v57, %v2177_v34 }
 0x20a   : > { %v756_v60 = vpop.f32.mrf.mxu1 }
 0x20b   : > { %915 = vst [vmem:[%s2184_s17 + $0x30] sm:$0xff] %v2218_v58  ;;  %v2223_v61 = vmax.f32 %v762_v59, 0.0  ;;  %v757_v62 = vadd.f32 %v2177_v34, %v756_v60 }
 0x20c   : > { %v1672_v63 = vpop.f32.mrf.mxu1 }
 0x20d   : > { %918 = vst [vmem:[%s2184_s17 + $0x48] sm:$0xff] %v2223_v61  ;;  %v2228_v1 = vmax.f32 %v757_v62, 0.0  ;;  %v772_v2 = vadd.f32 %v1672_v63, %v2177_v34 }
 0x20e   : > { %v766_v3 = vpop.f32.mrf.mxu1 }
 0x20f   : > { %917 = vst [vmem:[%s2184_s17 + $0x40] sm:$0xff] %v2228_v1  ;;  %v2233_v4 = vmax.f32 %v772_v2, 0.0  ;;  %v767_v5 = vadd.f32 %v2177_v34, %v766_v3 }
 0x210   : > { %v1675_v6 = vpop.f32.mrf.mxu1 }
 0x211   : > { %920 = vst [vmem:[%s2184_s17 + $0x58] sm:$0xff] %v2233_v4  ;;  %v2238_v7 = vmax.f32 %v767_v5, 0.0  ;;  %v782_v8 = vadd.f32 %v1675_v6, %v2177_v34 }
 0x212   : > { %v776_v9 = vpop.f32.mrf.mxu1 }
 0x213   : > { %919 = vst [vmem:[%s2184_s17 + $0x50] sm:$0xff] %v2238_v7  ;;  %v2243_v10 = vmax.f32 %v782_v8, 0.0  ;;  %v777_v11 = vadd.f32 %v2177_v34, %v776_v9 }
 0x214   : > { %v1678_v12 = vpop.f32.mrf.mxu1 }
 0x215   : > { %922 = vst [vmem:[%s2184_s17 + $0x68] sm:$0xff] %v2243_v10  ;;  %v2248_v13 = vmax.f32 %v777_v11, 0.0  ;;  %v792_v14 = vadd.f32 %v1678_v12, %v2177_v34 }
 0x216   : > { %v786_v15 = vpop.f32.mrf.mxu1 }
 0x217   : > { %921 = vst [vmem:[%s2184_s17 + $0x60] sm:$0xff] %v2248_v13  ;;  %v2253_v16 = vmax.f32 %v792_v14, 0.0  ;;  %v787_v17 = vadd.f32 %v2177_v34, %v786_v15 }
 0x218   : > { %v1681_v18 = vpop.f32.mrf.mxu1 }
 0x219   : > { %924 = vst [vmem:[%s2184_s17 + $0x78] sm:$0xff] %v2253_v16  ;;  %v2258_v19 = vmax.f32 %v787_v17, 0.0  ;;  %v802_v20 = vadd.f32 %v1681_v18, %v2177_v34 }
 0x21a   : > { %v796_v21 = vpop.f32.mrf.mxu1 }
 0x21b   : > { %923 = vst [vmem:[%s2184_s17 + $0x70] sm:$0xff] %v2258_v19  ;;  %v2263_v22 = vmax.f32 %v802_v20, 0.0  ;;  %v797_v23 = vadd.f32 %v2177_v34, %v796_v21 }
 0x21c   : > { %v1684_v24 = vpop.f32.mrf.mxu1 }
 0x21d   : > { %926 = vst [vmem:[%s2184_s17 + $0x88] sm:$0xff] %v2263_v22  ;;  %v2268_v25 = vmax.f32 %v797_v23, 0.0  ;;  %v812_v26 = vadd.f32 %v1684_v24, %v2177_v34 }
 0x21e   : > { %v806_v27 = vpop.f32.mrf.mxu1 }
 0x21f   : > { %925 = vst [vmem:[%s2184_s17 + $0x80] sm:$0xff] %v2268_v25  ;;  %v2273_v28 = vmax.f32 %v812_v26, 0.0  ;;  %v807_v29 = vadd.f32 %v2177_v34, %v806_v27 }
 0x220   : > { %v1687_v30 = vpop.f32.mrf.mxu1 }
 0x221   : > { %928 = vst [vmem:[%s2184_s17 + $0x98] sm:$0xff] %v2273_v28  ;;  %v2278_v31 = vmax.f32 %v807_v29, 0.0  ;;  %v822_v32 = vadd.f32 %v1687_v30, %v2177_v34 }
 0x222   : > { %v816_v33 = vpop.f32.mrf.mxu1 }
 0x223   : > { %927 = vst [vmem:[%s2184_s17 + $0x90] sm:$0xff] %v2278_v31  ;;  %v2283_v35 = vmax.f32 %v822_v32, 0.0  ;;  %v817_v36 = vadd.f32 %v2177_v34, %v816_v33 }
 0x224   : > { %v1690_v37 = vpop.f32.mrf.mxu1 }
 0x225   : > { %930 = vst [vmem:[%s2184_s17 + $0xa8] sm:$0xff] %v2283_v35  ;;  %v2288_v0 = vmax.f32 %v817_v36, 0.0  ;;  %v832_v39 = vadd.f32 %v1690_v37, %v2177_v34 }
 0x226   : > { %v826_v41 = vpop.f32.mrf.mxu1 }
 0x227   : > { %929 = vst [vmem:[%s2184_s17 + $0xa0] sm:$0xff] %v2288_v0  ;;  %v2293_v42 = vmax.f32 %v832_v39, 0.0  ;;  %v827_v44 = vadd.f32 %v2177_v34, %v826_v41 }
 0x228   : > { %v1693_v45 = vpop.f32.mrf.mxu1 }
 0x229   : > { %932 = vst [vmem:[%s2184_s17 + $0xb8] sm:$0xff] %v2293_v42  ;;  %v2298_v47 = vmax.f32 %v827_v44, 0.0  ;;  %v842_v48 = vadd.f32 %v1693_v45, %v2177_v34 }
 0x22a   : > { %v836_v50 = vpop.f32.mrf.mxu1 }
 0x22b   : > { %931 = vst [vmem:[%s2184_s17 + $0xb0] sm:$0xff] %v2298_v47  ;;  %v2303_v51 = vmax.f32 %v842_v48, 0.0  ;;  %v837_v53 = vadd.f32 %v2177_v34, %v836_v50 }
 0x22c   : > { %v1696_v54 = vpop.f32.mrf.mxu1 }
 0x22d   : > { %934 = vst [vmem:[%s2184_s17 + $0xc8] sm:$0xff] %v2303_v51  ;;  %v2308_v56 = vmax.f32 %v837_v53, 0.0  ;;  %v852_v57 = vadd.f32 %v1696_v54, %v2177_v34 }
 0x22e   : > { %v846_v59 = vpop.f32.mrf.mxu1 }
 0x22f   : > { %933 = vst [vmem:[%s2184_s17 + $0xc0] sm:$0xff] %v2308_v56  ;;  %v2313_v60 = vmax.f32 %v852_v57, 0.0  ;;  %v847_v62 = vadd.f32 %v2177_v34, %v846_v59 }
 0x230   : > { %v1699_v63 = vpop.f32.mrf.mxu1 }
 0x231   : > { %936 = vst [vmem:[%s2184_s17 + $0xd8] sm:$0xff] %v2313_v60  ;;  %v2318_v2 = vmax.f32 %v847_v62, 0.0  ;;  %v862_v3 = vadd.f32 %v1699_v63, %v2177_v34 }
 0x232   : > { %v856_v5 = vpop.f32.mrf.mxu1 }
 0x233   : > { %935 = vst [vmem:[%s2184_s17 + $0xd0] sm:$0xff] %v2318_v2  ;;  %v2323_v6 = vmax.f32 %v862_v3, 0.0  ;;  %v857_v8 = vadd.f32 %v2177_v34, %v856_v5 }
 0x234   : > { %v1702_v9 = vpop.f32.mrf.mxu1 }
 0x235   : > { %938 = vst [vmem:[%s2184_s17 + $0xe8] sm:$0xff] %v2323_v6  ;;  %v2328_v11 = vmax.f32 %v857_v8, 0.0  ;;  %v872_v12 = vadd.f32 %v1702_v9, %v2177_v34 }
 0x236   : > { %v866_v14 = vpop.f32.mrf.mxu1 }
 0x237   : > { %937 = vst [vmem:[%s2184_s17 + $0xe0] sm:$0xff] %v2328_v11  ;;  %v2333_v15 = vmax.f32 %v872_v12, 0.0  ;;  %v867_v17 = vadd.f32 %v2177_v34, %v866_v14  ;;  %944 = sbr.rel (%p2623_p8) target bundleno = 574 (0x23e), region = 64 }
 0x239   : > { %940 = vst [vmem:[%s2184_s17 + $0xf8] sm:$0xff] %v2333_v15  ;;  %v2338_v18 = vmax.f32 %v867_v17, 0.0 }
 0x23b   : > { %939 = vst [vmem:[%s2184_s17 + $0xf0] sm:$0xff] %v2338_v18 }
 0x23c   : > { %v1930_v20 = vmov 0.0  }
 0x23d   : > { %945 = vst [vmem:[#allocation2] sm:$0x1] %v1930_v20  ;;  %946 = vst [vmem:[#allocation3] sm:$0x1] %v1930_v20 }
 0x23e PF: > { %v948_v21 = vadd.f32 %v2181_v38, %v2188_v40  ;;  %v988_v24 = vmul.f32 %v2188_v40, %v2188_v40  ;;  %v989_v26 = vmul.f32 %v2181_v38, %v2181_v38  ;;  %v990_v29 = vmul.f32 %v2198_v46, %v2198_v46  ;;  %p1441_p13 = scmp.ne.s32.totalorder %s1993_s28, 1 }
 0x23f   : > { %v991_v32 = vmul.f32 %v2193_v43, %v2193_v43  ;;  %v992_v37 = vmul.f32 %v2208_v52, %v2208_v52  ;;  %v993_v38 = vmul.f32 %v2203_v49, %v2203_v49  ;;  %v994_v44 = vmul.f32 %v2218_v58, %v2218_v58 }
 0x240   : > { %v949_v23 = vadd.f32 %v948_v21, %v2198_v46  ;;  %v1020_v33 = vadd.f32 %v989_v26, %v988_v24  ;;  %v995_v48 = vmul.f32 %v2213_v55, %v2213_v55  ;;  %v996_v53 = vmul.f32 %v2228_v1, %v2228_v1 }
 0x241   : > { %v997_v57 = vmul.f32 %v2223_v61, %v2223_v61  ;;  %v998_v62 = vmul.f32 %v2238_v7, %v2238_v7  ;;  %v999_v3 = vmul.f32 %v2233_v4, %v2233_v4  ;;  %v1000_v8 = vmul.f32 %v2248_v13, %v2248_v13 }
 0x242   : > { %v950_v34 = vadd.f32 %v949_v23, %v2193_v43  ;;  %v1021_v40 = vadd.f32 %v1020_v33, %v990_v29  ;;  %v1001_v12 = vmul.f32 %v2243_v10, %v2243_v10  ;;  %v1002_v17 = vmul.f32 %v2258_v19, %v2258_v19 }
 0x243   : > { %v1003_v21 = vmul.f32 %v2253_v16, %v2253_v16  ;;  %v1005_v26 = vmul.f32 %v2263_v22, %v2263_v22  ;;  %v1006_v29 = vmul.f32 %v2278_v31, %v2278_v31 }
 0x244   : > { %v951_v27 = vadd.f32 %v950_v34, %v2208_v52  ;;  %v1022_v41 = vadd.f32 %v1021_v40, %v991_v32  ;;  %v1004_v34 = vmul.f32 %v2268_v25, %v2268_v25  ;;  %v1007_v32 = vmul.f32 %v2273_v28, %v2273_v28 }
 0x245   : > { %v1009_v40 = vmul.f32 %v2283_v35, %v2283_v35 }
 0x246   : > { %v952_v30 = vadd.f32 %v951_v27, %v2203_v49  ;;  %v1023_v45 = vadd.f32 %v1022_v41, %v992_v37 }
 0x248   : > { %v953_v36 = vadd.f32 %v952_v30, %v2218_v58  ;;  %v1024_v50 = vadd.f32 %v1023_v45, %v993_v38  ;;  %v1010_v38 = vmul.f32 %v2298_v47, %v2298_v47  ;;  %v1012_v45 = vmul.f32 %v2308_v56, %v2308_v56 }
 0x24a   : > { %v954_v39 = vadd.f32 %v953_v36, %v2213_v55  ;;  %v1025_v54 = vadd.f32 %v1024_v50, %v994_v44  ;;  %v1008_v36 = vmul.f32 %v2288_v0, %v2288_v0 }
 0x24c   : > { %v955_v46 = vadd.f32 %v954_v39, %v2228_v1  ;;  %v1026_v59 = vadd.f32 %v1025_v54, %v995_v48  ;;  %v1013_v48 = vmul.f32 %v2303_v51, %v2303_v51  ;;  %v1015_v54 = vmul.f32 %v2313_v60, %v2313_v60 }
 0x24e   : > { %v956_v43 = vadd.f32 %v955_v46, %v2223_v61  ;;  %v1027_v63 = vadd.f32 %v1026_v59, %v996_v53  ;;  %v1011_v46 = vmul.f32 %v2293_v42, %v2293_v42 }
 0x250   : > { %v957_v52 = vadd.f32 %v956_v43, %v2238_v7  ;;  %v1028_v5 = vadd.f32 %v1027_v63, %v997_v57  ;;  %v1016_v57 = vmul.f32 %v2328_v11, %v2328_v11  ;;  %v1018_v63 = vmul.f32 %v2338_v18, %v2338_v18 }
 0x252   : > { %v958_v49 = vadd.f32 %v957_v52, %v2233_v4  ;;  %v1029_v9 = vadd.f32 %v1028_v5, %v998_v62  ;;  %v1014_v52 = vmul.f32 %v2318_v2, %v2318_v2 }
 0x254   : > { %v959_v58 = vadd.f32 %v958_v49, %v2248_v13  ;;  %v1030_v14 = vadd.f32 %v1029_v9, %v999_v3 }
 0x256   : > { %v960_v55 = vadd.f32 %v959_v58, %v2243_v10  ;;  %v1031_v20 = vadd.f32 %v1030_v14, %v1000_v8  ;;  %v1017_v58 = vmul.f32 %v2323_v6, %v2323_v6 }
 0x258   : > { %v961_v1 = vadd.f32 %v960_v55, %v2258_v19  ;;  %v1032_v23 = vadd.f32 %v1031_v20, %v1001_v12  ;;  %v947_v12 = vld [vmem:[#allocation2] sm:$0x1] }
 0x25a   : > { %v962_v61 = vadd.f32 %v961_v1, %v2253_v16  ;;  %v1033_v24 = vadd.f32 %v1032_v23, %v1002_v17 }
 0x25c   : > { %v963_v7 = vadd.f32 %v962_v61, %v2268_v25  ;;  %v1034_v27 = vadd.f32 %v1033_v24, %v1003_v21  ;;  %v987_v21 = vld [vmem:[#allocation3] sm:$0x1] }
 0x25e   : > { %v964_v4 = vadd.f32 %v963_v7, %v2263_v22  ;;  %v1035_v30 = vadd.f32 %v1034_v27, %v1004_v34 }
 0x260   : > { %v965_v13 = vadd.f32 %v964_v4, %v2278_v31  ;;  %v1036_v33 = vadd.f32 %v1035_v30, %v1005_v26 }
 0x262   : > { %v966_v10 = vadd.f32 %v965_v13, %v2273_v28  ;;  %v1037_v37 = vadd.f32 %v1036_v33, %v1006_v29 }
 0x264   : > { %v967_v19 = vadd.f32 %v966_v10, %v2288_v0  ;;  %v1038_v39 = vadd.f32 %v1037_v37, %v1007_v32 }
 0x266   : > { %v968_v16 = vadd.f32 %v967_v19, %v2283_v35  ;;  %v1039_v41 = vadd.f32 %v1038_v39, %v1008_v36 }
 0x268   : > { %v969_v25 = vadd.f32 %v968_v16, %v2298_v47  ;;  %v1040_v44 = vadd.f32 %v1039_v41, %v1009_v40 }
 0x26a   : > { %v970_v22 = vadd.f32 %v969_v25, %v2293_v42  ;;  %v1041_v43 = vadd.f32 %v1040_v44, %v1010_v38 }
 0x26c   : > { %v971_v31 = vadd.f32 %v970_v22, %v2308_v56  ;;  %v1042_v50 = vadd.f32 %v1041_v43, %v1011_v46 }
 0x26e   : > { %v972_v28 = vadd.f32 %v971_v31, %v2303_v51  ;;  %v1043_v53 = vadd.f32 %v1042_v50, %v1012_v45 }
 0x270   : > { %v973_v0 = vadd.f32 %v972_v28, %v2318_v2  ;;  %v1044_v49 = vadd.f32 %v1043_v53, %v1013_v48 }
 0x272   : > { %v974_v35 = vadd.f32 %v973_v0, %v2313_v60  ;;  %v1045_v59 = vadd.f32 %v1044_v49, %v1014_v52  ;;  %v1019_v60 = vmul.f32 %v2333_v15, %v2333_v15 }
 0x274   : > { %v975_v47 = vadd.f32 %v974_v35, %v2328_v11  ;;  %v1046_v62 = vadd.f32 %v1045_v59, %v1015_v54 }
 0x276   : > { %v976_v42 = vadd.f32 %v975_v47, %v2323_v6  ;;  %v1047_v55 = vadd.f32 %v1046_v62, %v1016_v57 }
 0x278   : > { %v977_v56 = vadd.f32 %v976_v42, %v2338_v18  ;;  %v1048_v5 = vadd.f32 %v1047_v55, %v1017_v58 }
 0x27a   : > { %v978_v51 = vadd.f32 %v977_v56, %v2333_v15  ;;  %v1049_v8 = vadd.f32 %v1048_v5, %v1018_v63 }
 0x27c   : > { %v979_v2 = vrot.slane %v978_v51, 4  ;;  %v1050_v9 = vadd.f32 %v1049_v8, %v1019_v60 }
 0x27e   : > { %v980_v3 = vadd.f32 %v979_v2, %v978_v51  ;;  %v1051_v14 = vrot.slane %v1050_v9, 4 }
 0x280   : > { %v981_v1 = vrot.slane %v980_v3, 2  ;;  %v1052_v6 = vadd.f32 %v1051_v14, %v1050_v9 }
 0x282   : > { %v982_v11 = vadd.f32 %v981_v1, %v980_v3  ;;  %v1053_v20 = vrot.slane %v1052_v6, 2 }
 0x284   : > { %v983_v61 = vrot.slane %v982_v11, 1  ;;  %v1054_v4 = vadd.f32 %v1053_v20, %v1052_v6 }
 0x286   : > { %v984_v7 = vadd.f32 %v983_v61, %v982_v11  ;;  %v1055_v18 = vrot.slane %v1054_v4, 1 }
 0x288   : > { %v985_v17 = vadd.f32 %v984_v7, %v947_v12  ;;  %v1056_v23 = vadd.f32 %v1055_v18, %v1054_v4  ;;  %1062 = sbr.rel (%p1441_p13) target bundleno = 727 (0x2d7), region = 68 }
 0x28a   : > { %986 = vst [vmem:[#allocation2] sm:$0x1] %v985_v17  ;;  %v1057_v13 = vadd.f32 %v1056_v23, %v987_v21 }
 0x28c   : > { %1058 = vst [vmem:[#allocation3] sm:$0x1] %v1057_v13 }
 0x28d   : > { %v1142_v29 = vlaneseq  ;;  %v1072_v16 = vld [vmem:[%s2609_s5] sm:$0x1]  ;;  %v1077_v37 = vld [vmem:[#allocation10] sm:$0xff]  ;;  %v1078_v22 = vld [vmem:[#allocation10 + $0x8] sm:$0xff] }
 0x28e   : > { %v1074_v36 = vld [vmem:[%s2610_s6] sm:$0x1]  ;;  %v1079_v40 = vld [vmem:[#allocation10 + $0x10] sm:$0xff]  ;;  %v1081_v31 = vld [vmem:[#allocation10 + $0x20] sm:$0xff] }
 0x28f   : > { %v1143_v30 = vshrl.u32 %v1142_v29, 7  ;;  %v1080_v39 = vld [vmem:[#allocation10 + $0x18] sm:$0xff]  ;;  %v1082_v28 = vld [vmem:[#allocation10 + $0x28] sm:$0xff]  ;;  %v1083_v46 = vld [vmem:[#allocation10 + $0x30] sm:$0xff] }
 0x290   : > { %v1084_v44 = vld [vmem:[#allocation10 + $0x38] sm:$0xff]  ;;  %v1085_v0 = vld [vmem:[#allocation10 + $0x40] sm:$0xff]  ;;  %v1086_v45 = vld [vmem:[#allocation10 + $0x48] sm:$0xff] }
 0x291   : > { %v1063_v15 = vld [vmem:[#allocation2] sm:$0x1]  ;;  %v1144_v32 = vsub.s32 0, %v1143_v30  ;;  %v1087_v43 = vld [vmem:[#allocation10 + $0x50] sm:$0xff]  ;;  %v1089_v53 = vld [vmem:[#allocation10 + $0x60] sm:$0xff] }
 0x292   : > { %v1065_v24 = vmul.f32 0.001953125, %v1063_v15  ;;  %v1088_v52 = vld [vmem:[#allocation10 + $0x58] sm:$0xff]  ;;  %v1090_v42 = vld [vmem:[#allocation10 + $0x68] sm:$0xff]  ;;  %v1091_v11 = vld [vmem:[#allocation10 + $0x70] sm:$0xff] }
 0x293   : > { %v1066_v34 = vld [vmem:[#allocation3] sm:$0x1]  ;;  %v1093_v61 = vld [vmem:[#allocation10 + $0x80] sm:$0xff]  ;;  %v1094_v17 = vld [vmem:[#allocation10 + $0x88] sm:$0xff] }
 0x294   : > { %v1067_v10 = vmul.f32 0.001953125, %v1066_v34  ;;  %v1068_v26 = vmul.f32 %v1065_v24, %v1065_v24  ;;  %v1092_v9 = vld [vmem:[#allocation10 + $0x78] sm:$0xff]  ;;  %v1095_v20 = vld [vmem:[#allocation10 + $0x90] sm:$0xff]  ;;  %v1097_v15 = vld [vmem:[#allocation10 + $0xa0] sm:$0xff] }
 0x295   : > { %v1096_v4 = vld [vmem:[#allocation10 + $0x98] sm:$0xff]  ;;  %v1098_v34 = vld [vmem:[#allocation10 + $0xa8] sm:$0xff] }
 0x296   : > { %v1069_v27 = vsub.f32 %v1067_v10, %v1068_v26 }
 0x298   : > { %v1070_v19 = vadd.f32 1e-05, %v1069_v27 }
 0x29a   : > { %1775 = vrsqrt.f32 %v1070_v19 }
 0x2a7   : > { %v1776_v33 = vpop.eup %1775 }
 0x2a8   : > { %v1073_v25 = vmul.f32 %v1776_v33, %v1072_v16  ;;  %v1100_v33 = vld [vmem:[#allocation10 + $0xb8] sm:$0xff] }
 0x2aa   : > { %v1075_v38 = vmul.f32 %v1073_v25, %v1065_v24  ;;  %v2447_v41 = vrot.slane %v1073_v25, %v1144_v32  ;;  %v1101_v25 = vld [vmem:[#allocation10 + $0xc0] sm:$0xff] }
 0x2ac   : > { %v1076_v35 = vsub.f32 %v1074_v36, %v1075_v38  ;;  %v1147_v48 = vmul.f32 %v2447_v41, %v1077_v37  ;;  %v1148_v50 = vmul.f32 %v2447_v41, %v1078_v22  ;;  %v1149_v47 = vmul.f32 %v2447_v41, %v1079_v40  ;;  %v1104_v38 = vld [vmem:[#allocation10 + $0xd8] sm:$0xff] }
 0x2ad   : > { %v1150_v54 = vmul.f32 %v2447_v41, %v1080_v39  ;;  %v1151_v49 = vmul.f32 %v2447_v41, %v1081_v31  ;;  %v1152_v56 = vmul.f32 %v2447_v41, %v1082_v28  ;;  %v1153_v57 = vmul.f32 %v2447_v41, %v1083_v46  ;;  %v1102_v39 = vld [vmem:[#allocation10 + $0xc8] sm:$0xff]  ;;  %v1103_v31 = vld [vmem:[#allocation10 + $0xd0] sm:$0xff] }
 0x2ae   : > { %v2456_v59 = vrot.slane %v1076_v35, %v1144_v32  ;;  %v1154_v51 = vmul.f32 %v2447_v41, %v1084_v44  ;;  %v1155_v58 = vmul.f32 %v2447_v41, %v1085_v0  ;;  %v1156_v62 = vmul.f32 %v2447_v41, %v1086_v45  ;;  %v1099_v32 = vld [vmem:[#allocation10 + $0xb0] sm:$0xff]  ;;  %v1105_v45 = vld [vmem:[#allocation10 + $0xe0] sm:$0xff] }
 0x2af   : > { %v1157_v2 = vmul.f32 %v2447_v41, %v1087_v43  ;;  %v1158_v63 = vmul.f32 %v2447_v41, %v1088_v52  ;;  %v1159_v55 = vmul.f32 %v2447_v41, %v1089_v53  ;;  %v1160_v3 = vmul.f32 %v2447_v41, %v1090_v42  ;;  %v1106_v43 = vld [vmem:[#allocation10 + $0xe8] sm:$0xff] }
 0x2b0   : > { %v1217_v60 = vadd.f32 %v2456_v59, %v1147_v48  ;;  %v1218_v5 = vadd.f32 %v2456_v59, %v1148_v50  ;;  %v1219_v1 = vadd.f32 %v2456_v59, %v1149_v47  ;;  %v1220_v8 = vadd.f32 %v2456_v59, %v1150_v54 }
 0x2b1   : > { %v1221_v12 = vadd.f32 %v2456_v59, %v1151_v49  ;;  %v1222_v14 = vadd.f32 %v2456_v59, %v1152_v56  ;;  %v1223_v7 = vadd.f32 %v2456_v59, %v1153_v57  ;;  %v1224_v6 = vadd.f32 %v2456_v59, %v1154_v51  ;;  %v1107_v49 = vld [vmem:[#allocation10 + $0xf0] sm:$0xff]  ;;  %v1108_v56 = vld [vmem:[#allocation10 + $0xf8] sm:$0xff]  ;;  %v1109_v57 = vld [vmem:[#allocation10 + $0x100] sm:$0xff] }
 0x2b2   : > { %1281 = vst [vmem:[#allocation10] sm:$0xff] %v1217_v60  ;;  %1282 = vst [vmem:[#allocation10 + $0x8] sm:$0xff] %v1218_v5  ;;  %v1225_v18 = vadd.f32 %v2456_v59, %v1155_v58  ;;  %v1226_v21 = vadd.f32 %v2456_v59, %v1156_v62  ;;  %v1227_v23 = vadd.f32 %v2456_v59, %v1157_v2 }
 0x2b3   : > { %1283 = vst [vmem:[#allocation10 + $0x10] sm:$0xff] %v1219_v1  ;;  %1284 = vst [vmem:[#allocation10 + $0x18] sm:$0xff] %v1220_v8  ;;  %v1228_v13 = vadd.f32 %v2456_v59, %v1158_v63  ;;  %v1229_v24 = vadd.f32 %v2456_v59, %v1159_v55  ;;  %v1230_v10 = vadd.f32 %v2456_v59, %v1160_v3  ;;  %v1110_v63 = vld [vmem:[#allocation10 + $0x108] sm:$0xff]  ;;  %v1111_v55 = vld [vmem:[#allocation10 + $0x110] sm:$0xff] }
 0x2b4   : > { %1285 = vst [vmem:[#allocation10 + $0x20] sm:$0xff] %v1221_v12  ;;  %1286 = vst [vmem:[#allocation10 + $0x28] sm:$0xff] %v1222_v14  ;;  %v1161_v26 = vmul.f32 %v2447_v41, %v1091_v11  ;;  %v1162_v27 = vmul.f32 %v2447_v41, %v1092_v9  ;;  %v1163_v19 = vmul.f32 %v2447_v41, %v1093_v61  ;;  %v1112_v3 = vld [vmem:[#allocation10 + $0x118] sm:$0xff]  ;;  %v1113_v11 = vld [vmem:[#allocation10 + $0x120] sm:$0xff] }
 0x2b5   : > { %1287 = vst [vmem:[#allocation10 + $0x30] sm:$0xff] %v1223_v7  ;;  %1288 = vst [vmem:[#allocation10 + $0x38] sm:$0xff] %v1224_v6  ;;  %v1164_v29 = vmul.f32 %v2447_v41, %v1094_v17  ;;  %v1165_v30 = vmul.f32 %v2447_v41, %v1095_v20  ;;  %v1166_v16 = vmul.f32 %v2447_v41, %v1096_v4  ;;  %v1114_v9 = vld [vmem:[#allocation10 + $0x128] sm:$0xff] }
 0x2b6   : > { %1289 = vst [vmem:[#allocation10 + $0x40] sm:$0xff] %v1225_v18  ;;  %1290 = vst [vmem:[#allocation10 + $0x48] sm:$0xff] %v1226_v21  ;;  %v1231_v36 = vadd.f32 %v2456_v59, %v1161_v26  ;;  %v1232_v37 = vadd.f32 %v2456_v59, %v1162_v27  ;;  %v1167_v22 = vmul.f32 %v2447_v41, %v1097_v15  ;;  %v1115_v18 = vld [vmem:[#allocation10 + $0x130] sm:$0xff]  ;;  %v1116_v21 = vld [vmem:[#allocation10 + $0x138] sm:$0xff] }
 0x2b7   : > { %1291 = vst [vmem:[#allocation10 + $0x50] sm:$0xff] %v1227_v23  ;;  %1292 = vst [vmem:[#allocation10 + $0x58] sm:$0xff] %v1228_v13  ;;  %v1168_v40 = vmul.f32 %v2447_v41, %v1098_v34  ;;  %v1233_v28 = vadd.f32 %v2456_v59, %v1163_v19  ;;  %v1234_v46 = vadd.f32 %v2456_v59, %v1164_v29  ;;  %v1117_v23 = vld [vmem:[#allocation10 + $0x140] sm:$0xff]  ;;  %v1119_v26 = vld [vmem:[#allocation10 + $0x150] sm:$0xff] }
 0x2b8   : > { %1293 = vst [vmem:[#allocation10 + $0x60] sm:$0xff] %v1229_v24  ;;  %1294 = vst [vmem:[#allocation10 + $0x68] sm:$0xff] %v1230_v10  ;;  %v1235_v44 = vadd.f32 %v2456_v59, %v1165_v30  ;;  %v1236_v0 = vadd.f32 %v2456_v59, %v1166_v16  ;;  %v1237_v35 = vadd.f32 %v2456_v59, %v1167_v22  ;;  %v1118_v10 = vld [vmem:[#allocation10 + $0x148] sm:$0xff]  ;;  %v1120_v27 = vld [vmem:[#allocation10 + $0x158] sm:$0xff] }
 0x2b9   : > { %1295 = vst [vmem:[#allocation10 + $0x70] sm:$0xff] %v1231_v36  ;;  %1296 = vst [vmem:[#allocation10 + $0x78] sm:$0xff] %v1232_v37  ;;  %v1238_v48 = vadd.f32 %v2456_v59, %v1168_v40  ;;  %v1169_v50 = vmul.f32 %v2447_v41, %v1099_v32  ;;  %v1170_v47 = vmul.f32 %v2447_v41, %v1100_v33  ;;  %v1121_v32 = vld [vmem:[#allocation10 + $0x160] sm:$0xff]  ;;  %v1122_v33 = vld [vmem:[#allocation10 + $0x168] sm:$0xff] }
 0x2ba   : > { %1297 = vst [vmem:[#allocation10 + $0x80] sm:$0xff] %v1233_v28  ;;  %1298 = vst [vmem:[#allocation10 + $0x88] sm:$0xff] %v1234_v46  ;;  %v1171_v52 = vmul.f32 %v2447_v41, %v1101_v25  ;;  %v1172_v53 = vmul.f32 %v2447_v41, %v1102_v39  ;;  %v1173_v42 = vmul.f32 %v2447_v41, %v1103_v31  ;;  %v1123_v28 = vld [vmem:[#allocation10 + $0x170] sm:$0xff]  ;;  %v1124_v46 = vld [vmem:[#allocation10 + $0x178] sm:$0xff] }
 0x2bb   : > { %1299 = vst [vmem:[#allocation10 + $0x90] sm:$0xff] %v1235_v44  ;;  %1300 = vst [vmem:[#allocation10 + $0x98] sm:$0xff] %v1236_v0  ;;  %v1174_v54 = vmul.f32 %v2447_v41, %v1104_v38  ;;  %v1239_v51 = vadd.f32 %v2456_v59, %v1169_v50  ;;  %v1240_v58 = vadd.f32 %v2456_v59, %v1170_v47  ;;  %v1125_v44 = vld [vmem:[#allocation10 + $0x180] sm:$0xff]  ;;  %v1127_v50 = vld [vmem:[#allocation10 + $0x190] sm:$0xff] }
 0x2bc   : > { %1301 = vst [vmem:[#allocation10 + $0xa0] sm:$0xff] %v1237_v35  ;;  %1302 = vst [vmem:[#allocation10 + $0xa8] sm:$0xff] %v1238_v48  ;;  %v1175_v62 = vmul.f32 %v2447_v41, %v1105_v45  ;;  %v1176_v2 = vmul.f32 %v2447_v41, %v1106_v43  ;;  %v1241_v60 = vadd.f32 %v2456_v59, %v1171_v52  ;;  %v1126_v48 = vld [vmem:[#allocation10 + $0x188] sm:$0xff]  ;;  %v1128_v47 = vld [vmem:[#allocation10 + $0x198] sm:$0xff] }
 0x2bd   : > { %v1242_v5 = vadd.f32 %v2456_v59, %v1172_v53  ;;  %v1243_v1 = vadd.f32 %v2456_v59, %v1173_v42  ;;  %v1244_v8 = vadd.f32 %v2456_v59, %v1174_v54  ;;  %1303 = vst [vmem:[#allocation10 + $0xb0] sm:$0xff] %v1239_v51  ;;  %1304 = vst [vmem:[#allocation10 + $0xb8] sm:$0xff] %v1240_v58 }
 0x2be   : > { %v1245_v61 = vadd.f32 %v2456_v59, %v1175_v62  ;;  %v1246_v12 = vadd.f32 %v2456_v59, %v1176_v2  ;;  %v1177_v14 = vmul.f32 %v2447_v41, %v1107_v49  ;;  %v1178_v7 = vmul.f32 %v2447_v41, %v1108_v56  ;;  %1305 = vst [vmem:[#allocation10 + $0xc0] sm:$0xff] %v1241_v60  ;;  %v1129_v49 = vld [vmem:[#allocation10 + $0x1a0] sm:$0xff]  ;;  %v1130_v56 = vld [vmem:[#allocation10 + $0x1a8] sm:$0xff]  ;;  %v1131_v60 = vld [vmem:[#allocation10 + $0x1b0] sm:$0xff] }
 0x2bf   : > { %1306 = vst [vmem:[#allocation10 + $0xc8] sm:$0xff] %v1242_v5  ;;  %1307 = vst [vmem:[#allocation10 + $0xd0] sm:$0xff] %v1243_v1  ;;  %v1179_v6 = vmul.f32 %v2447_v41, %v1109_v57  ;;  %v1180_v17 = vmul.f32 %v2447_v41, %v1110_v63  ;;  %v1181_v20 = vmul.f32 %v2447_v41, %v1111_v55  ;;  %v1132_v5 = vld [vmem:[#allocation10 + $0x1b8] sm:$0xff]  ;;  %v1133_v1 = vld [vmem:[#allocation10 + $0x1c0] sm:$0xff] }
 0x2c0   : > { %1308 = vst [vmem:[#allocation10 + $0xd8] sm:$0xff] %v1244_v8  ;;  %v1182_v4 = vmul.f32 %v2447_v41, %v1112_v3  ;;  %1309 = vst [vmem:[#allocation10 + $0xe0] sm:$0xff] %v1245_v61  ;;  %v1247_v13 = vadd.f32 %v2456_v59, %v1177_v14  ;;  %v1248_v15 = vadd.f32 %v2456_v59, %v1178_v7  ;;  %v1135_v14 = vld [vmem:[#allocation10 + $0x1d0] sm:$0xff]  ;;  %v1136_v7 = vld [vmem:[#allocation10 + $0x1d8] sm:$0xff] }
 0x2c1   : > { %1310 = vst [vmem:[#allocation10 + $0xe8] sm:$0xff] %v1246_v12  ;;  %v1183_v34 = vmul.f32 %v2447_v41, %v1113_v11  ;;  %v1184_v24 = vmul.f32 %v2447_v41, %v1114_v9  ;;  %v1249_v19 = vadd.f32 %v2456_v59, %v1179_v6  ;;  %v1250_v29 = vadd.f32 %v2456_v59, %v1180_v17  ;;  %v1134_v12 = vld [vmem:[#allocation10 + $0x1c8] sm:$0xff] }
 0x2c2   : > { %v1251_v30 = vadd.f32 %v2456_v59, %v1181_v20  ;;  %v1252_v16 = vadd.f32 %v2456_v59, %v1182_v4  ;;  %1311 = vst [vmem:[#allocation10 + $0xf0] sm:$0xff] %v1247_v13  ;;  %1312 = vst [vmem:[#allocation10 + $0xf8] sm:$0xff] %v1248_v15  ;;  %v1185_v37 = vmul.f32 %v2447_v41, %v1115_v18  ;;  %v1137_v18 = vld [vmem:[#allocation10 + $0x1e0] sm:$0xff] }
 0x2c3   : > { %v1253_v25 = vadd.f32 %v2456_v59, %v1183_v34  ;;  %v1254_v36 = vadd.f32 %v2456_v59, %v1184_v24  ;;  %v1186_v22 = vmul.f32 %v2447_v41, %v1116_v21  ;;  %1313 = vst [vmem:[#allocation10 + $0x100] sm:$0xff] %v1249_v19  ;;  %1314 = vst [vmem:[#allocation10 + $0x108] sm:$0xff] %v1250_v29  ;;  %v1138_v21 = vld [vmem:[#allocation10 + $0x1e8] sm:$0xff]  ;;  %v1139_v19 = vld [vmem:[#allocation10 + $0x1f0] sm:$0xff] }
 0x2c4   : > { %1315 = vst [vmem:[#allocation10 + $0x110] sm:$0xff] %v1251_v30  ;;  %1316 = vst [vmem:[#allocation10 + $0x118] sm:$0xff] %v1252_v16  ;;  %v1187_v40 = vmul.f32 %v2447_v41, %v1117_v23  ;;  %v1188_v39 = vmul.f32 %v2447_v41, %v1118_v10  ;;  %v1189_v31 = vmul.f32 %v2447_v41, %v1119_v26  ;;  %v1140_v29 = vld [vmem:[#allocation10 + $0x1f8] sm:$0xff] }
 0x2c5   : > { %v1190_v38 = vmul.f32 %v2447_v41, %v1120_v27  ;;  %1317 = vst [vmem:[#allocation10 + $0x120] sm:$0xff] %v1253_v25  ;;  %1318 = vst [vmem:[#allocation10 + $0x128] sm:$0xff] %v1254_v36  ;;  %v1255_v0 = vadd.f32 %v2456_v59, %v1185_v37  ;;  %v1256_v45 = vadd.f32 %v2456_v59, %v1186_v22 }
 0x2c6   : > { %v1191_v43 = vmul.f32 %v2447_v41, %v1121_v32  ;;  %v1192_v35 = vmul.f32 %v2447_v41, %v1122_v33  ;;  %v1257_v52 = vadd.f32 %v2456_v59, %v1187_v40  ;;  %v1258_v53 = vadd.f32 %v2456_v59, %v1188_v39 }
 0x2c7   : > { %v1259_v42 = vadd.f32 %v2456_v59, %v1189_v31  ;;  %v1260_v54 = vadd.f32 %v2456_v59, %v1190_v38  ;;  %1319 = vst [vmem:[#allocation10 + $0x130] sm:$0xff] %v1255_v0  ;;  %1320 = vst [vmem:[#allocation10 + $0x138] sm:$0xff] %v1256_v45  ;;  %v1193_v58 = vmul.f32 %v2447_v41, %v1123_v28 }
 0x2c8   : > { %v1261_v57 = vadd.f32 %v2456_v59, %v1191_v43  ;;  %v1262_v51 = vadd.f32 %v2456_v59, %v1192_v35  ;;  %v1194_v62 = vmul.f32 %v2447_v41, %v1124_v46  ;;  %1321 = vst [vmem:[#allocation10 + $0x140] sm:$0xff] %v1257_v52  ;;  %1322 = vst [vmem:[#allocation10 + $0x148] sm:$0xff] %v1258_v53 }
 0x2c9   : > { %1323 = vst [vmem:[#allocation10 + $0x150] sm:$0xff] %v1259_v42  ;;  %1324 = vst [vmem:[#allocation10 + $0x158] sm:$0xff] %v1260_v54  ;;  %v1195_v2 = vmul.f32 %v2447_v41, %v1125_v44  ;;  %v1196_v63 = vmul.f32 %v2447_v41, %v1126_v48  ;;  %v1197_v55 = vmul.f32 %v2447_v41, %v1127_v50 }
 0x2ca   : > { %v1198_v3 = vmul.f32 %v2447_v41, %v1128_v47  ;;  %1325 = vst [vmem:[#allocation10 + $0x160] sm:$0xff] %v1261_v57  ;;  %1326 = vst [vmem:[#allocation10 + $0x168] sm:$0xff] %v1262_v51  ;;  %v1263_v8 = vadd.f32 %v2456_v59, %v1193_v58  ;;  %v1264_v11 = vadd.f32 %v2456_v59, %v1194_v62 }
 0x2cb   : > { %v1199_v9 = vmul.f32 %v2447_v41, %v1129_v49  ;;  %v1200_v61 = vmul.f32 %v2447_v41, %v1130_v56  ;;  %v1265_v6 = vadd.f32 %v2456_v59, %v1195_v2  ;;  %v1266_v17 = vadd.f32 %v2456_v59, %v1196_v63 }
 0x2cc   : > { %v1267_v20 = vadd.f32 %v2456_v59, %v1197_v55  ;;  %v1268_v4 = vadd.f32 %v2456_v59, %v1198_v3  ;;  %1327 = vst [vmem:[#allocation10 + $0x170] sm:$0xff] %v1263_v8  ;;  %1328 = vst [vmem:[#allocation10 + $0x178] sm:$0xff] %v1264_v11  ;;  %v1201_v15 = vmul.f32 %v2447_v41, %v1131_v60 }
 0x2cd   : > { %v1269_v23 = vadd.f32 %v2456_v59, %v1199_v9  ;;  %v1270_v13 = vadd.f32 %v2456_v59, %v1200_v61  ;;  %v1202_v34 = vmul.f32 %v2447_v41, %v1132_v5  ;;  %1329 = vst [vmem:[#allocation10 + $0x180] sm:$0xff] %v1265_v6  ;;  %1330 = vst [vmem:[#allocation10 + $0x188] sm:$0xff] %v1266_v17 }
 0x2ce   : > { %1331 = vst [vmem:[#allocation10 + $0x190] sm:$0xff] %v1267_v20  ;;  %1332 = vst [vmem:[#allocation10 + $0x198] sm:$0xff] %v1268_v4  ;;  %v1203_v24 = vmul.f32 %v2447_v41, %v1133_v1  ;;  %v1204_v10 = vmul.f32 %v2447_v41, %v1134_v12  ;;  %v1205_v26 = vmul.f32 %v2447_v41, %v1135_v14 }
 0x2cf   : > { %v1206_v27 = vmul.f32 %v2447_v41, %v1136_v7  ;;  %1333 = vst [vmem:[#allocation10 + $0x1a0] sm:$0xff] %v1269_v23  ;;  %1334 = vst [vmem:[#allocation10 + $0x1a8] sm:$0xff] %v1270_v13  ;;  %v1271_v30 = vadd.f32 %v2456_v59, %v1201_v15  ;;  %v1272_v16 = vadd.f32 %v2456_v59, %v1202_v34 }
 0x2d0   : > { %v1207_v32 = vmul.f32 %v2447_v41, %v1137_v18  ;;  %v1208_v33 = vmul.f32 %v2447_v41, %v1138_v21  ;;  %v1273_v25 = vadd.f32 %v2456_v59, %v1203_v24  ;;  %v1274_v36 = vadd.f32 %v2456_v59, %v1204_v10 }
 0x2d1   : > { %v1275_v37 = vadd.f32 %v2456_v59, %v1205_v26  ;;  %v1276_v22 = vadd.f32 %v2456_v59, %v1206_v27  ;;  %1335 = vst [vmem:[#allocation10 + $0x1b0] sm:$0xff] %v1271_v30  ;;  %1336 = vst [vmem:[#allocation10 + $0x1b8] sm:$0xff] %v1272_v16  ;;  %v1209_v31 = vmul.f32 %v2447_v41, %v1139_v19 }
 0x2d2   : > { %v1277_v40 = vadd.f32 %v2456_v59, %v1207_v32  ;;  %v1278_v39 = vadd.f32 %v2456_v59, %v1208_v33  ;;  %v1210_v38 = vmul.f32 %v2447_v41, %v1140_v29  ;;  %1337 = vst [vmem:[#allocation10 + $0x1c0] sm:$0xff] %v1273_v25  ;;  %1338 = vst [vmem:[#allocation10 + $0x1c8] sm:$0xff] %v1274_v36 }
 0x2d3   : > { %1339 = vst [vmem:[#allocation10 + $0x1d0] sm:$0xff] %v1275_v37  ;;  %1340 = vst [vmem:[#allocation10 + $0x1d8] sm:$0xff] %v1276_v22  ;;  %v1279_v28 = vadd.f32 %v2456_v59, %v1209_v31 }
 0x2d4   : > { %1341 = vst [vmem:[#allocation10 + $0x1e0] sm:$0xff] %v1277_v40  ;;  %1342 = vst [vmem:[#allocation10 + $0x1e8] sm:$0xff] %v1278_v39  ;;  %v1280_v46 = vadd.f32 %v2456_v59, %v1210_v38 }
 0x2d5   : > { %1343 = vst [vmem:[#allocation10 + $0x1f0] sm:$0xff] %v1279_v28 }
 0x2d6   : > { %1344 = vst [vmem:[#allocation10 + $0x1f8] sm:$0xff] %v1280_v46 }
 0x2d7 PF: > { %p1733_p2 = scmp.eq.s32.totalorder %s1993_s28, 1  ;;  %s1931_s24 = smov [#allocation10]  }
 0x2d8   : > { %s1351_s11 = sshll.u32 %s1931_s24, 4  ;;  %s1352_s11 = int_to_ptr.vmem [resolvable:$true] %s1351_s11 }
 0x2d9   : > { %s1857_s13 = scalar_lea.vmem %s1352_s11, 8192  ;;  %p1864_p10 = scmp.lt.s32.totalorder %s1352_s11, %s1352_s11 }
 0x2da   : > { %p1858_p9 = scmp.ne.s32.totalorder %s1352_s11, %s1857_s13  ;;  %p1865_p11 = scmp.lt.s32.totalorder %s1857_s13, %s1857_s13 }
 0x2dc   : > { %p1859_p3 = pnand %p1858_p9, %p1733_p2  ;;  %p1866_p12 = por %p1865_p11, %p1864_p10 }
 0x2de   : > { %p1860_p7 = pneg %p1859_p3 }
 0x2e0   : > { %p1867_p0 = pnand %p1866_p12, %p1860_p7 }
 0x2e2   : > { %1870 = shalt.err (!%p1867_p0)
}
 0x2e3   : > { %s1932_s12 = smov 128   ;;  %s1933_s27 = smov 8  }
 0x2e4   : > { %1714 = dma.vmem_to_hbm [thread:$0]  (%p1733_p2), %s1352_s11, 8192, %s2611_s7, [#allocation6], %s1932_s12, %s1932_s12, %s1933_s27  }
 0x2e5   : > { %1906 = dma.done.wait (%p1733_p2), [#allocation6], 8192  }
 0x2e6   : > { %1908 = vsyncadd (%p1733_p2), [#allocation6], 4294959104 }
 0x2e7 PF: > { %p19_p4 = scmp.ge.s32.totalorder %s2043_s21, 4   ;;  %s2624_s24 = smov %s1915_s25 }
 0x2e8   : > { %s2625_s25 = smov %s1919_s26  ;;  %s2626_s26 = smov %s2054_s8 }
 0x2e9   : > { %s2627_s27 = smov %s2043_s21  ;;  %21 = sbr.rel (!%p19_p4) target bundleno = 5 (0x5), region = 102 }
 0x2ee   :  { %1367 = vsyncpa [#allocation5], 1 }
 0x2ef   :  { %1369 = vsyncpa [#allocation5 + $0x1], 1 }
 0x2f0   :  { %1370 = vsyncpa [#allocation8], 1 }
 0x2f1   :  { %1371 = vsyncpa [#allocation6], 1 }
 0x2f2   :  { %1373 = vsyncpa [#allocation6 + $0x1], 1 }

</bundles_post_ra>
